<compile_context>
chip_gen: v7x
topology: tpu7x:2x2x1
jax: 0.10.0
libtpu: 0.0.40
codegen_flags: <defaults>
</compile_context>

<pallas_src>
import jax
import jax.numpy as jnp
from jax.experimental import pallas as pl
from jax.experimental.pallas import tpu as pltpu

LN_EPS = 1e-5  # PyTorch nn.LayerNorm default


def _layernorm(x, gamma, beta):
    # Centered (two-pass) biased variance, matching PyTorch LayerNorm and
    # avoiding the E[x^2] - mu^2 cancellation issue flagged in review.
    mu = jnp.mean(x, axis=-1, keepdims=True)
    xc = x - mu
    var = jnp.mean(xc * xc, axis=-1, keepdims=True)
    return xc * jax.lax.rsqrt(var + LN_EPS) * gamma + beta


def bronet_critics_kernel(
    s_ref, a_ref,                 # (tb, S) / (tb, A) activation tiles (f32)
    wps_ref, wpa_ref,             # (S, H) / (A, H)   projection weights (bf16)
    pvec_ref,                     # (3, H)  f32: [bias_p, gamma_p, beta_p]
    w1_ref, w2_ref,               # (L, H, H) bf16 block weights
    lnv_ref,                      # (L, 6, H) f32: [b1, g1, beta1, b2, g2, beta2]
    wf_ref, bf_ref,               # (H, O) bf16 / (1, O) f32 final Linear
    out_ref,                      # (tb, O)
):
    s = s_ref[...].astype(jnp.bfloat16)
    a = a_ref[...].astype(jnp.bfloat16)

    bp, gp, betap = pvec_ref[0], pvec_ref[1], pvec_ref[2]

    # projection: concat(s, a) @ Wp == s @ Wp_s + a @ Wp_a  -> LayerNorm -> ReLU
    h = (jnp.dot(s, wps_ref[...], preferred_element_type=jnp.float32)
         + jnp.dot(a, wpa_ref[...], preferred_element_type=jnp.float32)
         + bp)
    h = jnp.maximum(_layernorm(h, gp, betap), 0.0)

    num_layers = w1_ref.shape[0]

    def layer_body(i, h):
        v = lnv_ref[i]  # (6, H) f32
        y = jnp.dot(h.astype(jnp.bfloat16), w1_ref[i],
                    preferred_element_type=jnp.float32) + v[0]
        y = jnp.maximum(_layernorm(y, v[1], v[2]), 0.0)
        y = jnp.dot(y.astype(jnp.bfloat16), w2_ref[i],
                    preferred_element_type=jnp.float32) + v[3]
        y = _layernorm(y, v[4], v[5])
        return h + y  # residual

    # fori_loop bounds live ranges at large H; fully unroll for small L so the
    # LLO scheduler sees the whole pipeline.
    h = jax.lax.fori_loop(0, num_layers, layer_body, h,
                          unroll=(num_layers <= 4))

    # TODO(synk): for O == 1, a VPU row-reduction + lane-dense (nb, tb) output
    # layout would avoid the N=1 MXU matmul and the masked store on a 1-wide
    # output block.
    out = (jnp.dot(h.astype(jnp.bfloat16), wf_ref[...],
                   preferred_element_type=jnp.float32) + bf_ref[...])
    out_ref[...] = out.astype(out_ref.dtype)


def _round_up(x, m):
    return ((x + m - 1) // m) * m


def _pick_batch_tile(B, batch_tile):
    if batch_tile is not None:
        return batch_tile
    # MXU-friendly tile; awkward batches are padded UP to a multiple of the
    # tile instead of shrinking the tile to a small divisor.
    # TODO(synk): on v6e (128 MiB VMEM) a 512 tile is worth sweeping.
    if B <= 256:
        return max(8, _round_up(B, 8))
    return 256


def _vmem_limit_bytes(S, A, H, O, L, tb, weight_buffers):
    bf16, f32 = 2, 4
    weights = weight_buffers * bf16 * (S * H + A * H + 2 * L * H * H + H * O)
    ln_bias = weight_buffers * f32 * (3 * H + 6 * L * H + O)
    acts = 2 * f32 * tb * (S + A + O)   # double-buffered input/output tiles
    temps = 6 * f32 * tb * H            # h / y / LayerNorm temporaries
    need = weights + ln_bias + acts + temps
    return int(min(max(2 * need + (4 << 20), 16 << 20), 64 << 20))


def bronet_critics_forward(state, action, params, *, batch_tile=None):
    """Both critics in one pallas_call.

    `params` is a dict of arrays whose leading axis (size 2) indexes the
    critic.  Returns (q1, q2).
    """
    B, S = state.shape
    _, A = action.shape
    H = params["wps"].shape[-1]
    O = params["wf"].shape[-1]
    L = params["w1"].shape[1]

    tb = _pick_batch_tile(B, batch_tile)
    B_pad = _round_up(B, tb)
    if B_pad != B:
        pad = ((0, B_pad - B), (0, 0))
        state = jnp.pad(state, pad)
        action = jnp.pad(action, pad)
    nb = B_pad // tb

    # Advisory cost estimate (matmul flops + one rsqrt per LayerNorm row).
    flops = 2 * 2 * B_pad * H * ((S + A) + 2 * L * H + O)
    transcendentals = 2 * B_pad * (2 * L + 1)
    weight_bytes = 2 * (2 * (S * H + A * H + 2 * L * H * H + H * O)
                        + 4 * (3 * H + 6 * L * H + O))
    bytes_accessed = 4 * (B_pad * (S + A) + 2 * B_pad * O) + weight_bytes
    cost = pl.CostEstimate(flops=flops, transcendentals=transcendentals,
                           bytes_accessed=bytes_accessed)

    args = (state, action,
            params["wps"], params["wpa"], params["pvec"],
            params["w1"], params["w2"], params["lnv"],
            params["wf"], params["bf"])

    def run(single_buffer_weights):
        def crit_spec(per_critic_shape):
            # Whole per-critic block, critic dim squeezed; block index depends
            # only on the critic grid axis so weights stay VMEM-resident across
            # batch tiles (batch is the innermost grid axis).  Single-buffered:
            # double-buffering a block that changes only at the critic
            # transition is pure VMEM waste.
            n = len(per_critic_shape)
            kw = {}
            if single_buffer_weights:
                kw["pipeline_mode"] = pl.Buffered(1)
            return pl.BlockSpec(
                (None,) + tuple(per_critic_shape),
                lambda c, i, _n=n: (c,) + (0,) * _n,
                **kw,
            )

        in_specs = [
            pl.BlockSpec((tb, S), lambda c, i: (i, 0)),   # state, tiled over batch
            pl.BlockSpec((tb, A), lambda c, i: (i, 0)),   # action, tiled over batch
            crit_spec((S, H)), crit_spec((A, H)), crit_spec((3, H)),
            crit_spec((L, H, H)), crit_spec((L, H, H)), crit_spec((L, 6, H)),
            crit_spec((H, O)), crit_spec((1, O)),
        ]
        out_specs = pl.BlockSpec((None, tb, O), lambda c, i: (c, i, 0))

        # TODO(synk): for H >= ~512 on v7x (64 MiB VMEM) add a third
        # "arbitrary" grid axis over layers (stream w1[i]/w2[i] per layer) with
        # the running h in a VMEM scratch accumulator, instead of keeping the
        # full (L, H, H) stacks resident.
        # TODO(synk): on v7x, pin the critic axis to the 2 TensorCores
        # (CORE_PARALLEL) so each core holds only one critic's weights.
        return pl.pallas_call(
            bronet_critics_kernel,
            out_shape=jax.ShapeDtypeStruct((2, B_pad, O), state.dtype),
            grid_spec=pltpu.PrefetchScalarGridSpec(
                num_scalar_prefetch=0,
                grid=(2, nb),               # (critic, batch tile); batch innermost
                in_specs=in_specs,
                out_specs=out_specs,
            ),
            compiler_params=pltpu.CompilerParams(
                dimension_semantics=("parallel", "parallel"),
                vmem_limit_bytes=_vmem_limit_bytes(
                    S, A, H, O, L, tb,
                    weight_buffers=1 if single_buffer_weights else 2),
            ),
            cost_estimate=cost,
        )(*args)

    try:
        out = run(single_buffer_weights=True)
    except Exception:
        # Fallback for JAX versions where BlockSpec.pipeline_mode / Buffered(1)
        # is not supported by the pallas_call pipeliner.
        out = run(single_buffer_weights=False)

    out = out[:, :B, :]
    return out[0], out[1]


# ------------------------- parameter construction -------------------------

def init_critic_params(key, state_size, action_size, hidden_size, output_size,
                       bronet_layers):
    """Single-critic parameters matching BroNetCritic: orthogonal Linear
    weights (stored transposed as (in, out), bf16 for the MXU), zero biases,
    LayerNorm gamma=1 / beta=0 (kept f32).  The projection weight is split into
    a state part and an action part (the concat happens implicitly in the
    kernel).  Bias/LN vectors are packed:
      pvec = [bias_p, gamma_p, beta_p]                      (3, H)
      lnv  = [b1, g1, beta1, b2, g2, beta2] per layer       (L, 6, H)
    """
    ortho = jax.nn.initializers.orthogonal()
    keys = jax.random.split(key, 2 * bronet_layers + 2)
    H, L, O = hidden_size, bronet_layers, output_size

    def lin_w(k, fan_in, fan_out):
        # PyTorch weight is (out, in); store (in, out) for x @ W, in bf16.
        return ortho(k, (fan_out, fan_in), jnp.float32).T.astype(jnp.bfloat16)

    wp = ortho(keys[0], (H, state_size + action_size), jnp.float32).T
    wps = wp[:state_size].astype(jnp.bfloat16)
    wpa = wp[state_size:].astype(jnp.bfloat16)
    pvec = jnp.stack([jnp.zeros((H,), jnp.float32),
                      jnp.ones((H,), jnp.float32),
                      jnp.zeros((H,), jnp.float32)])

    w1s, w2s = [], []
    for i in range(L):
        w1s.append(lin_w(keys[1 + 2 * i], H, H))
        w2s.append(lin_w(keys[2 + 2 * i], H, H))
    lnv_one = jnp.stack([jnp.zeros((H,), jnp.float32),
                         jnp.ones((H,), jnp.float32),
                         jnp.zeros((H,), jnp.float32),
                         jnp.zeros((H,), jnp.float32),
                         jnp.ones((H,), jnp.float32),
                         jnp.zeros((H,), jnp.float32)])
    lnv = jnp.tile(lnv_one[None], (L, 1, 1))

    wf = lin_w(keys[-1], H, O)
    bf = jnp.zeros((1, O), jnp.float32)

    return {
        "wps": wps, "wpa": wpa, "pvec": pvec,
        "w1": jnp.stack(w1s), "w2": jnp.stack(w2s), "lnv": lnv,
        "wf": wf, "bf": bf,
    }


def stack_critic_params(p1, p2):
    """Stack two critics' params along a new leading axis of size 2."""
    return jax.tree_util.tree_map(lambda a, b: jnp.stack([a, b], axis=0), p1, p2)


# ------------------------------ reference ------------------------------

def _critic_ref(state, action, p):
    # Pure-JAX reference with the same bf16-operand / f32-accumulate matmuls.
    def mm(x, w):
        return jnp.dot(x.astype(jnp.bfloat16), w,
                       preferred_element_type=jnp.float32)

    h = mm(state, p["wps"]) + mm(action, p["wpa"]) + p["pvec"][0]
    h = jnp.maximum(_layernorm(h, p["pvec"][1], p["pvec"][2]), 0.0)
    for i in range(p["w1"].shape[0]):
        v = p["lnv"][i]
        y = mm(h, p["w1"][i]) + v[0]
        y = jnp.maximum(_layernorm(y, v[1], v[2]), 0.0)
        y = mm(y, p["w2"][i]) + v[3]
        y = _layernorm(y, v[4], v[5])
        h = h + y
    return mm(h, p["wf"]) + p["bf"]


if __name__ == "__main__":
    state_size = 12
    action_size = 6
    hidden_size = 32
    output_size = 1
    bronet_layers = 2

    root = jax.random.PRNGKey(0)
    k_data, k_c1, k_c2 = jax.random.split(root, 3)

    params1 = init_critic_params(k_c1, state_size, action_size, hidden_size,
                                 output_size, bronet_layers)
    params2 = init_critic_params(k_c2, state_size, action_size, hidden_size,
                                 output_size, bronet_layers)
    stacked = stack_critic_params(params1, params2)

    # batch=8 exercises the aligned path; batch=10 exercises pad-to-tile.
    for batch in (8, 10):
        ks, ka = jax.random.split(jax.random.fold_in(k_data, batch))
        state = jax.random.normal(ks, (batch, state_size), jnp.float32)
        action = jax.random.normal(ka, (batch, action_size), jnp.float32)

        q1, q2 = bronet_critics_forward(state, action, stacked)
        jax.block_until_ready((q1, q2))

        r1 = _critic_ref(state, action, params1)
        r2 = _critic_ref(state, action, params2)
        assert q1.shape == (batch, output_size)
        assert q2.shape == (batch, output_size)
        assert jnp.allclose(q1, r1, atol=5e-3, rtol=5e-3)
        assert jnp.allclose(q2, r2, atol=5e-3, rtol=5e-3)

    print("KERNEL_OK")
</pallas_src>

<mosaic_0001>
module attributes {stable_mosaic.version = 11 : i64} {
  func.func @bronet_critics_kernel(%arg0: i32, %arg1: i32, %arg2: memref<8x12xf32, #tpu.memory_space<vmem>>, %arg3: memref<8x6xf32, #tpu.memory_space<vmem>>, %arg4: memref<1x12x32xbf16, #tpu.memory_space<vmem>>, %arg5: memref<1x6x32xbf16, #tpu.memory_space<vmem>>, %arg6: memref<1x3x32xf32, #tpu.memory_space<vmem>>, %arg7: memref<1x2x32x32xbf16, #tpu.memory_space<vmem>>, %arg8: memref<1x2x32x32xbf16, #tpu.memory_space<vmem>>, %arg9: memref<1x2x6x32xf32, #tpu.memory_space<vmem>>, %arg10: memref<1x32x1xbf16, #tpu.memory_space<vmem>>, %arg11: memref<1x1x1xf32, #tpu.memory_space<vmem>>, %arg12: memref<1x8x1xf32, #tpu.memory_space<vmem>>) attributes {dimension_semantics = [#tpu.dimension_semantics<parallel>, #tpu.dimension_semantics<parallel>], iteration_bounds = array<i64: 2, 1>, scalar_prefetch = 0 : i64, scratch_operands = 0 : i64, tpu.core_type = #tpu.core_type<tc>, window_params = [{transform_indices = @transform_0, window_bounds = array<i64: 8, 12>}, {transform_indices = @transform_1, window_bounds = array<i64: 8, 6>}, {pipeline_mode = #tpu.pipeline_mode<synchronous>, transform_indices = @transform_2, window_bounds = array<i64: 1, 12, 32>}, {pipeline_mode = #tpu.pipeline_mode<synchronous>, transform_indices = @transform_3, window_bounds = array<i64: 1, 6, 32>}, {pipeline_mode = #tpu.pipeline_mode<synchronous>, transform_indices = @transform_4, window_bounds = array<i64: 1, 3, 32>}, {pipeline_mode = #tpu.pipeline_mode<synchronous>, transform_indices = @transform_5, window_bounds = array<i64: 1, 2, 32, 32>}, {pipeline_mode = #tpu.pipeline_mode<synchronous>, transform_indices = @transform_6, window_bounds = array<i64: 1, 2, 32, 32>}, {pipeline_mode = #tpu.pipeline_mode<synchronous>, transform_indices = @transform_7, window_bounds = array<i64: 1, 2, 6, 32>}, {pipeline_mode = #tpu.pipeline_mode<synchronous>, transform_indices = @transform_8, window_bounds = array<i64: 1, 32, 1>}, {pipeline_mode = #tpu.pipeline_mode<synchronous>, transform_indices = @transform_9, window_bounds = array<i64: 1, 1, 1>}, {transform_indices = @transform_10, window_bounds = array<i64: 1, 8, 1>}]} {
    %c0 = arith.constant 0 : index
    %c0_0 = arith.constant 0 : index
    %0 = vector.load %arg2[%c0, %c0_0] : memref<8x12xf32, #tpu.memory_space<vmem>>, vector<8x12xf32>
    %1 = arith.truncf %0 : vector<8x12xf32> to vector<8x12xbf16>
    %c0_1 = arith.constant 0 : index
    %c0_2 = arith.constant 0 : index
    %2 = vector.load %arg3[%c0_1, %c0_2] : memref<8x6xf32, #tpu.memory_space<vmem>>, vector<8x6xf32>
    %3 = arith.truncf %2 : vector<8x6xf32> to vector<8x6xbf16>
    %c0_3 = arith.constant 0 : index
    %c0_4 = arith.constant 0 : index
    %c0_5 = arith.constant 0 : index
    %4 = vector.load %arg6[%c0_3, %c0_4, %c0_5] : memref<1x3x32xf32, #tpu.memory_space<vmem>>, vector<1x1x32xf32>
    %5 = vector.shape_cast %4 : vector<1x1x32xf32> to vector<32xf32>
    %c0_6 = arith.constant 0 : index
    %c1 = arith.constant 1 : index
    %c0_7 = arith.constant 0 : index
    %6 = vector.load %arg6[%c0_6, %c1, %c0_7] : memref<1x3x32xf32, #tpu.memory_space<vmem>>, vector<1x1x32xf32>
    %7 = vector.shape_cast %6 : vector<1x1x32xf32> to vector<32xf32>
    %c0_8 = arith.constant 0 : index
    %c2 = arith.constant 2 : index
    %c0_9 = arith.constant 0 : index
    %8 = vector.load %arg6[%c0_8, %c2, %c0_9] : memref<1x3x32xf32, #tpu.memory_space<vmem>>, vector<1x1x32xf32>
    %9 = vector.shape_cast %8 : vector<1x1x32xf32> to vector<32xf32>
    %c0_10 = arith.constant 0 : index
    %c0_11 = arith.constant 0 : index
    %c0_12 = arith.constant 0 : index
    %10 = vector.load %arg4[%c0_10, %c0_11, %c0_12] : memref<1x12x32xbf16, #tpu.memory_space<vmem>>, vector<1x12x32xbf16>
    %11 = vector.shape_cast %10 : vector<1x12x32xbf16> to vector<12x32xbf16>
    %cst = arith.constant dense<0.000000e+00> : vector<8x32xf32>
    %12 = tpu.matmul %1, %11, %cst {dimension_numbers = #tpu.dot_dimension_numbers<[1], [0], [0], [1], [0, 0, 1, 1], [], []>} : vector<8x12xbf16>, vector<12x32xbf16>, vector<8x32xf32> -> vector<8x32xf32>
    %c0_13 = arith.constant 0 : index
    %c0_14 = arith.constant 0 : index
    %c0_15 = arith.constant 0 : index
    %13 = vector.load %arg5[%c0_13, %c0_14, %c0_15] : memref<1x6x32xbf16, #tpu.memory_space<vmem>>, vector<1x6x32xbf16>
    %14 = vector.shape_cast %13 : vector<1x6x32xbf16> to vector<6x32xbf16>
    %cst_16 = arith.constant dense<0.000000e+00> : vector<8x32xf32>
    %15 = tpu.matmul %3, %14, %cst_16 {dimension_numbers = #tpu.dot_dimension_numbers<[1], [0], [0], [1], [0, 0, 1, 1], [], []>} : vector<8x6xbf16>, vector<6x32xbf16>, vector<8x32xf32> -> vector<8x32xf32>
    %16 = arith.addf %12, %15 : vector<8x32xf32>
    %17 = vector.shape_cast %5 : vector<32xf32> to vector<1x32xf32>
    %18 = vector.broadcast %17 : vector<1x32xf32> to vector<8x32xf32>
    %19 = arith.addf %16, %18 : vector<8x32xf32>
    %cst_17 = arith.constant dense<0.000000e+00> : vector<8xf32>
    %20 = vector.multi_reduction <add>, %19, %cst_17 [1] : vector<8x32xf32> to vector<8xf32>
    %21 = vector.shape_cast %20 : vector<8xf32> to vector<8x1xf32>
    %cst_18 = arith.constant 3.200000e+01 : f32
    %22 = vector.broadcast %cst_18 : f32 to vector<8x1xf32>
    %23 = arith.divf %21, %22 : vector<8x1xf32>
    %24 = vector.broadcast %23 : vector<8x1xf32> to vector<8x32xf32>
    %25 = arith.subf %19, %24 : vector<8x32xf32>
    %26 = arith.mulf %25, %25 : vector<8x32xf32>
    %cst_19 = arith.constant dense<0.000000e+00> : vector<8xf32>
    %27 = vector.multi_reduction <add>, %26, %cst_19 [1] : vector<8x32xf32> to vector<8xf32>
    %28 = vector.shape_cast %27 : vector<8xf32> to vector<8x1xf32>
    %cst_20 = arith.constant 3.200000e+01 : f32
    %29 = vector.broadcast %cst_20 : f32 to vector<8x1xf32>
    %30 = arith.divf %28, %29 : vector<8x1xf32>
    %cst_21 = arith.constant 9.99999974E-6 : f32
    %31 = vector.broadcast %cst_21 : f32 to vector<8x1xf32>
    %32 = arith.addf %30, %31 : vector<8x1xf32>
    %33 = math.rsqrt %32 : vector<8x1xf32>
    %34 = vector.broadcast %33 : vector<8x1xf32> to vector<8x32xf32>
    %35 = arith.mulf %25, %34 : vector<8x32xf32>
    %36 = vector.shape_cast %7 : vector<32xf32> to vector<1x32xf32>
    %37 = vector.broadcast %36 : vector<1x32xf32> to vector<8x32xf32>
    %38 = arith.mulf %35, %37 : vector<8x32xf32>
    %39 = vector.shape_cast %9 : vector<32xf32> to vector<1x32xf32>
    %40 = vector.broadcast %39 : vector<1x32xf32> to vector<8x32xf32>
    %41 = arith.addf %38, %40 : vector<8x32xf32>
    %cst_22 = arith.constant 0.000000e+00 : f32
    %42 = vector.broadcast %cst_22 : f32 to vector<8x32xf32>
    %43 = arith.maximumf %41, %42 : vector<8x32xf32>
    %c0_i32 = arith.constant 0 : i32
    %c0_23 = arith.constant 0 : index
    %44 = arith.index_cast %c0_i32 : i32 to index
    %c0_24 = arith.constant 0 : index
    %c0_25 = arith.constant 0 : index
    %45 = vector.load %arg9[%c0_23, %44, %c0_24, %c0_25] : memref<1x2x6x32xf32, #tpu.memory_space<vmem>>, vector<1x1x6x32xf32>
    %46 = vector.shape_cast %45 : vector<1x1x6x32xf32> to vector<6x32xf32>
    %47 = arith.truncf %43 : vector<8x32xf32> to vector<8x32xbf16>
    %c0_26 = arith.constant 0 : index
    %48 = arith.index_cast %c0_i32 : i32 to index
    %c0_27 = arith.constant 0 : index
    %c0_28 = arith.constant 0 : index
    %49 = vector.load %arg7[%c0_26, %48, %c0_27, %c0_28] : memref<1x2x32x32xbf16, #tpu.memory_space<vmem>>, vector<1x1x32x32xbf16>
    %50 = vector.shape_cast %49 : vector<1x1x32x32xbf16> to vector<32x32xbf16>
    %cst_29 = arith.constant dense<0.000000e+00> : vector<8x32xf32>
    %51 = tpu.matmul %47, %50, %cst_29 {dimension_numbers = #tpu.dot_dimension_numbers<[1], [0], [0], [1], [0, 0, 1, 1], [], []>} : vector<8x32xbf16>, vector<32x32xbf16>, vector<8x32xf32> -> vector<8x32xf32>
    %52 = vector.extract_strided_slice %46 {offsets = [0, 0], sizes = [1, 32], strides = [1, 1]} : vector<6x32xf32> to vector<1x32xf32>
    %53 = vector.shape_cast %52 : vector<1x32xf32> to vector<32xf32>
    %54 = vector.shape_cast %53 : vector<32xf32> to vector<1x32xf32>
    %55 = vector.broadcast %54 : vector<1x32xf32> to vector<8x32xf32>
    %56 = arith.addf %51, %55 : vector<8x32xf32>
    %57 = vector.extract_strided_slice %46 {offsets = [1, 0], sizes = [1, 32], strides = [1, 1]} : vector<6x32xf32> to vector<1x32xf32>
    %58 = vector.shape_cast %57 : vector<1x32xf32> to vector<32xf32>
    %59 = vector.extract_strided_slice %46 {offsets = [2, 0], sizes = [1, 32], strides = [1, 1]} : vector<6x32xf32> to vector<1x32xf32>
    %60 = vector.shape_cast %59 : vector<1x32xf32> to vector<32xf32>
    %cst_30 = arith.constant dense<0.000000e+00> : vector<8xf32>
    %61 = vector.multi_reduction <add>, %56, %cst_30 [1] : vector<8x32xf32> to vector<8xf32>
    %62 = vector.shape_cast %61 : vector<8xf32> to vector<8x1xf32>
    %cst_31 = arith.constant 3.200000e+01 : f32
    %63 = vector.broadcast %cst_31 : f32 to vector<8x1xf32>
    %64 = arith.divf %62, %63 : vector<8x1xf32>
    %65 = vector.broadcast %64 : vector<8x1xf32> to vector<8x32xf32>
    %66 = arith.subf %56, %65 : vector<8x32xf32>
    %67 = arith.mulf %66, %66 : vector<8x32xf32>
    %cst_32 = arith.constant dense<0.000000e+00> : vector<8xf32>
    %68 = vector.multi_reduction <add>, %67, %cst_32 [1] : vector<8x32xf32> to vector<8xf32>
    %69 = vector.shape_cast %68 : vector<8xf32> to vector<8x1xf32>
    %cst_33 = arith.constant 3.200000e+01 : f32
    %70 = vector.broadcast %cst_33 : f32 to vector<8x1xf32>
    %71 = arith.divf %69, %70 : vector<8x1xf32>
    %cst_34 = arith.constant 9.99999974E-6 : f32
    %72 = vector.broadcast %cst_34 : f32 to vector<8x1xf32>
    %73 = arith.addf %71, %72 : vector<8x1xf32>
    %74 = math.rsqrt %73 : vector<8x1xf32>
    %75 = vector.broadcast %74 : vector<8x1xf32> to vector<8x32xf32>
    %76 = arith.mulf %66, %75 : vector<8x32xf32>
    %77 = vector.shape_cast %58 : vector<32xf32> to vector<1x32xf32>
    %78 = vector.broadcast %77 : vector<1x32xf32> to vector<8x32xf32>
    %79 = arith.mulf %76, %78 : vector<8x32xf32>
    %80 = vector.shape_cast %60 : vector<32xf32> to vector<1x32xf32>
    %81 = vector.broadcast %80 : vector<1x32xf32> to vector<8x32xf32>
    %82 = arith.addf %79, %81 : vector<8x32xf32>
    %cst_35 = arith.constant 0.000000e+00 : f32
    %83 = vector.broadcast %cst_35 : f32 to vector<8x32xf32>
    %84 = arith.maximumf %82, %83 : vector<8x32xf32>
    %85 = arith.truncf %84 : vector<8x32xf32> to vector<8x32xbf16>
    %c0_36 = arith.constant 0 : index
    %86 = arith.index_cast %c0_i32 : i32 to index
    %c0_37 = arith.constant 0 : index
    %c0_38 = arith.constant 0 : index
    %87 = vector.load %arg8[%c0_36, %86, %c0_37, %c0_38] : memref<1x2x32x32xbf16, #tpu.memory_space<vmem>>, vector<1x1x32x32xbf16>
    %88 = vector.shape_cast %87 : vector<1x1x32x32xbf16> to vector<32x32xbf16>
    %cst_39 = arith.constant dense<0.000000e+00> : vector<8x32xf32>
    %89 = tpu.matmul %85, %88, %cst_39 {dimension_numbers = #tpu.dot_dimension_numbers<[1], [0], [0], [1], [0, 0, 1, 1], [], []>} : vector<8x32xbf16>, vector<32x32xbf16>, vector<8x32xf32> -> vector<8x32xf32>
    %90 = vector.extract_strided_slice %46 {offsets = [3, 0], sizes = [1, 32], strides = [1, 1]} : vector<6x32xf32> to vector<1x32xf32>
    %91 = vector.shape_cast %90 : vector<1x32xf32> to vector<32xf32>
    %92 = vector.shape_cast %91 : vector<32xf32> to vector<1x32xf32>
    %93 = vector.broadcast %92 : vector<1x32xf32> to vector<8x32xf32>
    %94 = arith.addf %89, %93 : vector<8x32xf32>
    %95 = vector.extract_strided_slice %46 {offsets = [4, 0], sizes = [1, 32], strides = [1, 1]} : vector<6x32xf32> to vector<1x32xf32>
    %96 = vector.shape_cast %95 : vector<1x32xf32> to vector<32xf32>
    %97 = vector.extract_strided_slice %46 {offsets = [5, 0], sizes = [1, 32], strides = [1, 1]} : vector<6x32xf32> to vector<1x32xf32>
    %98 = vector.shape_cast %97 : vector<1x32xf32> to vector<32xf32>
    %cst_40 = arith.constant dense<0.000000e+00> : vector<8xf32>
    %99 = vector.multi_reduction <add>, %94, %cst_40 [1] : vector<8x32xf32> to vector<8xf32>
    %100 = vector.shape_cast %99 : vector<8xf32> to vector<8x1xf32>
    %cst_41 = arith.constant 3.200000e+01 : f32
    %101 = vector.broadcast %cst_41 : f32 to vector<8x1xf32>
    %102 = arith.divf %100, %101 : vector<8x1xf32>
    %103 = vector.broadcast %102 : vector<8x1xf32> to vector<8x32xf32>
    %104 = arith.subf %94, %103 : vector<8x32xf32>
    %105 = arith.mulf %104, %104 : vector<8x32xf32>
    %cst_42 = arith.constant dense<0.000000e+00> : vector<8xf32>
    %106 = vector.multi_reduction <add>, %105, %cst_42 [1] : vector<8x32xf32> to vector<8xf32>
    %107 = vector.shape_cast %106 : vector<8xf32> to vector<8x1xf32>
    %cst_43 = arith.constant 3.200000e+01 : f32
    %108 = vector.broadcast %cst_43 : f32 to vector<8x1xf32>
    %109 = arith.divf %107, %108 : vector<8x1xf32>
    %cst_44 = arith.constant 9.99999974E-6 : f32
    %110 = vector.broadcast %cst_44 : f32 to vector<8x1xf32>
    %111 = arith.addf %109, %110 : vector<8x1xf32>
    %112 = math.rsqrt %111 : vector<8x1xf32>
    %113 = vector.broadcast %112 : vector<8x1xf32> to vector<8x32xf32>
    %114 = arith.mulf %104, %113 : vector<8x32xf32>
    %115 = vector.shape_cast %96 : vector<32xf32> to vector<1x32xf32>
    %116 = vector.broadcast %115 : vector<1x32xf32> to vector<8x32xf32>
    %117 = arith.mulf %114, %116 : vector<8x32xf32>
    %118 = vector.shape_cast %98 : vector<32xf32> to vector<1x32xf32>
    %119 = vector.broadcast %118 : vector<1x32xf32> to vector<8x32xf32>
    %120 = arith.addf %117, %119 : vector<8x32xf32>
    %121 = arith.addf %43, %120 : vector<8x32xf32>
    %c1_i32 = arith.constant 1 : i32
    %c0_45 = arith.constant 0 : index
    %122 = arith.index_cast %c1_i32 : i32 to index
    %c0_46 = arith.constant 0 : index
    %c0_47 = arith.constant 0 : index
    %123 = vector.load %arg9[%c0_45, %122, %c0_46, %c0_47] : memref<1x2x6x32xf32, #tpu.memory_space<vmem>>, vector<1x1x6x32xf32>
    %124 = vector.shape_cast %123 : vector<1x1x6x32xf32> to vector<6x32xf32>
    %125 = arith.truncf %121 : vector<8x32xf32> to vector<8x32xbf16>
    %c0_48 = arith.constant 0 : index
    %126 = arith.index_cast %c1_i32 : i32 to index
    %c0_49 = arith.constant 0 : index
    %c0_50 = arith.constant 0 : index
    %127 = vector.load %arg7[%c0_48, %126, %c0_49, %c0_50] : memref<1x2x32x32xbf16, #tpu.memory_space<vmem>>, vector<1x1x32x32xbf16>
    %128 = vector.shape_cast %127 : vector<1x1x32x32xbf16> to vector<32x32xbf16>
    %cst_51 = arith.constant dense<0.000000e+00> : vector<8x32xf32>
    %129 = tpu.matmul %125, %128, %cst_51 {dimension_numbers = #tpu.dot_dimension_numbers<[1], [0], [0], [1], [0, 0, 1, 1], [], []>} : vector<8x32xbf16>, vector<32x32xbf16>, vector<8x32xf32> -> vector<8x32xf32>
    %130 = vector.extract_strided_slice %124 {offsets = [0, 0], sizes = [1, 32], strides = [1, 1]} : vector<6x32xf32> to vector<1x32xf32>
    %131 = vector.shape_cast %130 : vector<1x32xf32> to vector<32xf32>
    %132 = vector.shape_cast %131 : vector<32xf32> to vector<1x32xf32>
    %133 = vector.broadcast %132 : vector<1x32xf32> to vector<8x32xf32>
    %134 = arith.addf %129, %133 : vector<8x32xf32>
    %135 = vector.extract_strided_slice %124 {offsets = [1, 0], sizes = [1, 32], strides = [1, 1]} : vector<6x32xf32> to vector<1x32xf32>
    %136 = vector.shape_cast %135 : vector<1x32xf32> to vector<32xf32>
    %137 = vector.extract_strided_slice %124 {offsets = [2, 0], sizes = [1, 32], strides = [1, 1]} : vector<6x32xf32> to vector<1x32xf32>
    %138 = vector.shape_cast %137 : vector<1x32xf32> to vector<32xf32>
    %cst_52 = arith.constant dense<0.000000e+00> : vector<8xf32>
    %139 = vector.multi_reduction <add>, %134, %cst_52 [1] : vector<8x32xf32> to vector<8xf32>
    %140 = vector.shape_cast %139 : vector<8xf32> to vector<8x1xf32>
    %cst_53 = arith.constant 3.200000e+01 : f32
    %141 = vector.broadcast %cst_53 : f32 to vector<8x1xf32>
    %142 = arith.divf %140, %141 : vector<8x1xf32>
    %143 = vector.broadcast %142 : vector<8x1xf32> to vector<8x32xf32>
    %144 = arith.subf %134, %143 : vector<8x32xf32>
    %145 = arith.mulf %144, %144 : vector<8x32xf32>
    %cst_54 = arith.constant dense<0.000000e+00> : vector<8xf32>
    %146 = vector.multi_reduction <add>, %145, %cst_54 [1] : vector<8x32xf32> to vector<8xf32>
    %147 = vector.shape_cast %146 : vector<8xf32> to vector<8x1xf32>
    %cst_55 = arith.constant 3.200000e+01 : f32
    %148 = vector.broadcast %cst_55 : f32 to vector<8x1xf32>
    %149 = arith.divf %147, %148 : vector<8x1xf32>
    %cst_56 = arith.constant 9.99999974E-6 : f32
    %150 = vector.broadcast %cst_56 : f32 to vector<8x1xf32>
    %151 = arith.addf %149, %150 : vector<8x1xf32>
    %152 = math.rsqrt %151 : vector<8x1xf32>
    %153 = vector.broadcast %152 : vector<8x1xf32> to vector<8x32xf32>
    %154 = arith.mulf %144, %153 : vector<8x32xf32>
    %155 = vector.shape_cast %136 : vector<32xf32> to vector<1x32xf32>
    %156 = vector.broadcast %155 : vector<1x32xf32> to vector<8x32xf32>
    %157 = arith.mulf %154, %156 : vector<8x32xf32>
    %158 = vector.shape_cast %138 : vector<32xf32> to vector<1x32xf32>
    %159 = vector.broadcast %158 : vector<1x32xf32> to vector<8x32xf32>
    %160 = arith.addf %157, %159 : vector<8x32xf32>
    %cst_57 = arith.constant 0.000000e+00 : f32
    %161 = vector.broadcast %cst_57 : f32 to vector<8x32xf32>
    %162 = arith.maximumf %160, %161 : vector<8x32xf32>
    %163 = arith.truncf %162 : vector<8x32xf32> to vector<8x32xbf16>
    %c0_58 = arith.constant 0 : index
    %164 = arith.index_cast %c1_i32 : i32 to index
    %c0_59 = arith.constant 0 : index
    %c0_60 = arith.constant 0 : index
    %165 = vector.load %arg8[%c0_58, %164, %c0_59, %c0_60] : memref<1x2x32x32xbf16, #tpu.memory_space<vmem>>, vector<1x1x32x32xbf16>
    %166 = vector.shape_cast %165 : vector<1x1x32x32xbf16> to vector<32x32xbf16>
    %cst_61 = arith.constant dense<0.000000e+00> : vector<8x32xf32>
    %167 = tpu.matmul %163, %166, %cst_61 {dimension_numbers = #tpu.dot_dimension_numbers<[1], [0], [0], [1], [0, 0, 1, 1], [], []>} : vector<8x32xbf16>, vector<32x32xbf16>, vector<8x32xf32> -> vector<8x32xf32>
    %168 = vector.extract_strided_slice %124 {offsets = [3, 0], sizes = [1, 32], strides = [1, 1]} : vector<6x32xf32> to vector<1x32xf32>
    %169 = vector.shape_cast %168 : vector<1x32xf32> to vector<32xf32>
    %170 = vector.shape_cast %169 : vector<32xf32> to vector<1x32xf32>
    %171 = vector.broadcast %170 : vector<1x32xf32> to vector<8x32xf32>
    %172 = arith.addf %167, %171 : vector<8x32xf32>
    %173 = vector.extract_strided_slice %124 {offsets = [4, 0], sizes = [1, 32], strides = [1, 1]} : vector<6x32xf32> to vector<1x32xf32>
    %174 = vector.shape_cast %173 : vector<1x32xf32> to vector<32xf32>
    %175 = vector.extract_strided_slice %124 {offsets = [5, 0], sizes = [1, 32], strides = [1, 1]} : vector<6x32xf32> to vector<1x32xf32>
    %176 = vector.shape_cast %175 : vector<1x32xf32> to vector<32xf32>
    %cst_62 = arith.constant dense<0.000000e+00> : vector<8xf32>
    %177 = vector.multi_reduction <add>, %172, %cst_62 [1] : vector<8x32xf32> to vector<8xf32>
    %178 = vector.shape_cast %177 : vector<8xf32> to vector<8x1xf32>
    %cst_63 = arith.constant 3.200000e+01 : f32
    %179 = vector.broadcast %cst_63 : f32 to vector<8x1xf32>
    %180 = arith.divf %178, %179 : vector<8x1xf32>
    %181 = vector.broadcast %180 : vector<8x1xf32> to vector<8x32xf32>
    %182 = arith.subf %172, %181 : vector<8x32xf32>
    %183 = arith.mulf %182, %182 : vector<8x32xf32>
    %cst_64 = arith.constant dense<0.000000e+00> : vector<8xf32>
    %184 = vector.multi_reduction <add>, %183, %cst_64 [1] : vector<8x32xf32> to vector<8xf32>
    %185 = vector.shape_cast %184 : vector<8xf32> to vector<8x1xf32>
    %cst_65 = arith.constant 3.200000e+01 : f32
    %186 = vector.broadcast %cst_65 : f32 to vector<8x1xf32>
    %187 = arith.divf %185, %186 : vector<8x1xf32>
    %cst_66 = arith.constant 9.99999974E-6 : f32
    %188 = vector.broadcast %cst_66 : f32 to vector<8x1xf32>
    %189 = arith.addf %187, %188 : vector<8x1xf32>
    %190 = math.rsqrt %189 : vector<8x1xf32>
    %191 = vector.broadcast %190 : vector<8x1xf32> to vector<8x32xf32>
    %192 = arith.mulf %182, %191 : vector<8x32xf32>
    %193 = vector.shape_cast %174 : vector<32xf32> to vector<1x32xf32>
    %194 = vector.broadcast %193 : vector<1x32xf32> to vector<8x32xf32>
    %195 = arith.mulf %192, %194 : vector<8x32xf32>
    %196 = vector.shape_cast %176 : vector<32xf32> to vector<1x32xf32>
    %197 = vector.broadcast %196 : vector<1x32xf32> to vector<8x32xf32>
    %198 = arith.addf %195, %197 : vector<8x32xf32>
    %199 = arith.addf %121, %198 : vector<8x32xf32>
    %c2_i32 = arith.constant 2 : i32
    %200 = arith.truncf %199 : vector<8x32xf32> to vector<8x32xbf16>
    %c0_67 = arith.constant 0 : index
    %c0_68 = arith.constant 0 : index
    %c0_69 = arith.constant 0 : index
    %201 = vector.load %arg10[%c0_67, %c0_68, %c0_69] : memref<1x32x1xbf16, #tpu.memory_space<vmem>>, vector<1x32x1xbf16>
    %202 = vector.shape_cast %201 : vector<1x32x1xbf16> to vector<32x1xbf16>
    %cst_70 = arith.constant dense<0.000000e+00> : vector<8x1xf32>
    %203 = tpu.matmul %200, %202, %cst_70 {dimension_numbers = #tpu.dot_dimension_numbers<[1], [0], [0], [1], [0, 0, 1, 1], [], []>} : vector<8x32xbf16>, vector<32x1xbf16>, vector<8x1xf32> -> vector<8x1xf32>
    %c0_71 = arith.constant 0 : index
    %c0_72 = arith.constant 0 : index
    %c0_73 = arith.constant 0 : index
    %204 = vector.load %arg11[%c0_71, %c0_72, %c0_73] : memref<1x1x1xf32, #tpu.memory_space<vmem>>, vector<1x1x1xf32>
    %205 = vector.shape_cast %204 : vector<1x1x1xf32> to vector<1x1xf32>
    %206 = vector.broadcast %205 : vector<1x1xf32> to vector<8x1xf32>
    %207 = arith.addf %203, %206 : vector<8x1xf32>
    %c0_74 = arith.constant 0 : index
    %c0_75 = arith.constant 0 : index
    %c0_76 = arith.constant 0 : index
    %208 = vector.load %arg12[%c0_74, %c0_75, %c0_76] : memref<1x8x1xf32, #tpu.memory_space<vmem>>, vector<1x8x1xf32>
    %209 = vector.shape_cast %208 : vector<1x8x1xf32> to vector<8x1xf32>
    %210 = vector.shape_cast %207 : vector<8x1xf32> to vector<1x8x1xf32>
    tpu.vector_store %arg12[%c0_74, %c0_75, %c0_76], %210 {strides = array<i32>} : memref<1x8x1xf32, #tpu.memory_space<vmem>>, vector<1x8x1xf32>,
    return
  }
  func.func @transform_0(%arg0: i32, %arg1: i32) -> (i32, i32) {
    %c0_i32 = arith.constant 0 : i32
    %c0_i32_0 = arith.constant 0 : i32
    return %arg1, %c0_i32 : i32, i32
  }
  func.func @transform_1(%arg0: i32, %arg1: i32) -> (i32, i32) {
    %c0_i32 = arith.constant 0 : i32
    %c0_i32_0 = arith.constant 0 : i32
    return %arg1, %c0_i32 : i32, i32
  }
  func.func @transform_2(%arg0: i32, %arg1: i32) -> (i32, i32, i32) {
    %c0_i32 = arith.constant 0 : i32
    %c0_i32_0 = arith.constant 0 : i32
    %c0_i32_1 = arith.constant 0 : i32
    return %arg0, %c0_i32, %c0_i32_0 : i32, i32, i32
  }
  func.func @transform_3(%arg0: i32, %arg1: i32) -> (i32, i32, i32) {
    %c0_i32 = arith.constant 0 : i32
    %c0_i32_0 = arith.constant 0 : i32
    %c0_i32_1 = arith.constant 0 : i32
    return %arg0, %c0_i32, %c0_i32_0 : i32, i32, i32
  }
  func.func @transform_4(%arg0: i32, %arg1: i32) -> (i32, i32, i32) {
    %c0_i32 = arith.constant 0 : i32
    %c0_i32_0 = arith.constant 0 : i32
    %c0_i32_1 = arith.constant 0 : i32
    return %arg0, %c0_i32, %c0_i32_0 : i32, i32, i32
  }
  func.func @transform_5(%arg0: i32, %arg1: i32) -> (i32, i32, i32, i32) {
    %c0_i32 = arith.constant 0 : i32
    %c0_i32_0 = arith.constant 0 : i32
    %c0_i32_1 = arith.constant 0 : i32
    %c0_i32_2 = arith.constant 0 : i32
    return %arg0, %c0_i32, %c0_i32_0, %c0_i32_1 : i32, i32, i32, i32
  }
  func.func @transform_6(%arg0: i32, %arg1: i32) -> (i32, i32, i32, i32) {
    %c0_i32 = arith.constant 0 : i32
    %c0_i32_0 = arith.constant 0 : i32
    %c0_i32_1 = arith.constant 0 : i32
    %c0_i32_2 = arith.constant 0 : i32
    return %arg0, %c0_i32, %c0_i32_0, %c0_i32_1 : i32, i32, i32, i32
  }
  func.func @transform_7(%arg0: i32, %arg1: i32) -> (i32, i32, i32, i32) {
    %c0_i32 = arith.constant 0 : i32
    %c0_i32_0 = arith.constant 0 : i32
    %c0_i32_1 = arith.constant 0 : i32
    %c0_i32_2 = arith.constant 0 : i32
    return %arg0, %c0_i32, %c0_i32_0, %c0_i32_1 : i32, i32, i32, i32
  }
  func.func @transform_8(%arg0: i32, %arg1: i32) -> (i32, i32, i32) {
    %c0_i32 = arith.constant 0 : i32
    %c0_i32_0 = arith.constant 0 : i32
    %c0_i32_1 = arith.constant 0 : i32
    return %arg0, %c0_i32, %c0_i32_0 : i32, i32, i32
  }
  func.func @transform_9(%arg0: i32, %arg1: i32) -> (i32, i32, i32) {
    %c0_i32 = arith.constant 0 : i32
    %c0_i32_0 = arith.constant 0 : i32
    %c0_i32_1 = arith.constant 0 : i32
    return %arg0, %c0_i32, %c0_i32_0 : i32, i32, i32
  }
  func.func @transform_10(%arg0: i32, %arg1: i32) -> (i32, i32, i32) {
    %c0_i32 = arith.constant 0 : i32
    %c0_i32_0 = arith.constant 0 : i32
    return %arg0, %arg1, %c0_i32 : i32, i32, i32
  }
}

module attributes {stable_mosaic.version = 11 : i64} {
  func.func @bronet_critics_kernel(%arg0: i32, %arg1: i32, %arg2: memref<8x12xf32, #tpu.memory_space<vmem>>, %arg3: memref<8x6xf32, #tpu.memory_space<vmem>>, %arg4: memref<1x12x32xbf16, #tpu.memory_space<vmem>>, %arg5: memref<1x6x32xbf16, #tpu.memory_space<vmem>>, %arg6: memref<1x3x32xf32, #tpu.memory_space<vmem>>, %arg7: memref<1x2x32x32xbf16, #tpu.memory_space<vmem>>, %arg8: memref<1x2x32x32xbf16, #tpu.memory_space<vmem>>, %arg9: memref<1x2x6x32xf32, #tpu.memory_space<vmem>>, %arg10: memref<1x32x1xbf16, #tpu.memory_space<vmem>>, %arg11: memref<1x1x1xf32, #tpu.memory_space<vmem>>, %arg12: memref<1x8x1xf32, #tpu.memory_space<vmem>>) attributes {dimension_semantics = [#tpu.dimension_semantics<parallel>, #tpu.dimension_semantics<parallel>], iteration_bounds = array<i64: 2, 1>, scalar_prefetch = 0 : i64, scratch_operands = 0 : i64, tpu.core_type = #tpu.core_type<tc>, window_params = [{transform_indices = @transform_0, window_bounds = array<i64: 8, 12>}, {transform_indices = @transform_1, window_bounds = array<i64: 8, 6>}, {transform_indices = @transform_2, window_bounds = array<i64: 1, 12, 32>}, {transform_indices = @transform_3, window_bounds = array<i64: 1, 6, 32>}, {transform_indices = @transform_4, window_bounds = array<i64: 1, 3, 32>}, {transform_indices = @transform_5, window_bounds = array<i64: 1, 2, 32, 32>}, {transform_indices = @transform_6, window_bounds = array<i64: 1, 2, 32, 32>}, {transform_indices = @transform_7, window_bounds = array<i64: 1, 2, 6, 32>}, {transform_indices = @transform_8, window_bounds = array<i64: 1, 32, 1>}, {transform_indices = @transform_9, window_bounds = array<i64: 1, 1, 1>}, {transform_indices = @transform_10, window_bounds = array<i64: 1, 8, 1>}]} {
    %c0 = arith.constant 0 : index
    %c0_0 = arith.constant 0 : index
    %0 = vector.load %arg2[%c0, %c0_0] : memref<8x12xf32, #tpu.memory_space<vmem>>, vector<8x12xf32>
    %1 = arith.truncf %0 : vector<8x12xf32> to vector<8x12xbf16>
    %c0_1 = arith.constant 0 : index
    %c0_2 = arith.constant 0 : index
    %2 = vector.load %arg3[%c0_1, %c0_2] : memref<8x6xf32, #tpu.memory_space<vmem>>, vector<8x6xf32>
    %3 = arith.truncf %2 : vector<8x6xf32> to vector<8x6xbf16>
    %c0_3 = arith.constant 0 : index
    %c0_4 = arith.constant 0 : index
    %c0_5 = arith.constant 0 : index
    %4 = vector.load %arg6[%c0_3, %c0_4, %c0_5] : memref<1x3x32xf32, #tpu.memory_space<vmem>>, vector<1x1x32xf32>
    %5 = vector.shape_cast %4 : vector<1x1x32xf32> to vector<32xf32>
    %c0_6 = arith.constant 0 : index
    %c1 = arith.constant 1 : index
    %c0_7 = arith.constant 0 : index
    %6 = vector.load %arg6[%c0_6, %c1, %c0_7] : memref<1x3x32xf32, #tpu.memory_space<vmem>>, vector<1x1x32xf32>
    %7 = vector.shape_cast %6 : vector<1x1x32xf32> to vector<32xf32>
    %c0_8 = arith.constant 0 : index
    %c2 = arith.constant 2 : index
    %c0_9 = arith.constant 0 : index
    %8 = vector.load %arg6[%c0_8, %c2, %c0_9] : memref<1x3x32xf32, #tpu.memory_space<vmem>>, vector<1x1x32xf32>
    %9 = vector.shape_cast %8 : vector<1x1x32xf32> to vector<32xf32>
    %c0_10 = arith.constant 0 : index
    %c0_11 = arith.constant 0 : index
    %c0_12 = arith.constant 0 : index
    %10 = vector.load %arg4[%c0_10, %c0_11, %c0_12] : memref<1x12x32xbf16, #tpu.memory_space<vmem>>, vector<1x12x32xbf16>
    %11 = vector.shape_cast %10 : vector<1x12x32xbf16> to vector<12x32xbf16>
    %cst = arith.constant dense<0.000000e+00> : vector<8x32xf32>
    %12 = tpu.matmul %1, %11, %cst {dimension_numbers = #tpu.dot_dimension_numbers<[1], [0], [0], [1], [0, 0, 1, 1], [], []>} : vector<8x12xbf16>, vector<12x32xbf16>, vector<8x32xf32> -> vector<8x32xf32>
    %c0_13 = arith.constant 0 : index
    %c0_14 = arith.constant 0 : index
    %c0_15 = arith.constant 0 : index
    %13 = vector.load %arg5[%c0_13, %c0_14, %c0_15] : memref<1x6x32xbf16, #tpu.memory_space<vmem>>, vector<1x6x32xbf16>
    %14 = vector.shape_cast %13 : vector<1x6x32xbf16> to vector<6x32xbf16>
    %cst_16 = arith.constant dense<0.000000e+00> : vector<8x32xf32>
    %15 = tpu.matmul %3, %14, %cst_16 {dimension_numbers = #tpu.dot_dimension_numbers<[1], [0], [0], [1], [0, 0, 1, 1], [], []>} : vector<8x6xbf16>, vector<6x32xbf16>, vector<8x32xf32> -> vector<8x32xf32>
    %16 = arith.addf %12, %15 : vector<8x32xf32>
    %17 = vector.shape_cast %5 : vector<32xf32> to vector<1x32xf32>
    %18 = vector.broadcast %17 : vector<1x32xf32> to vector<8x32xf32>
    %19 = arith.addf %16, %18 : vector<8x32xf32>
    %cst_17 = arith.constant dense<0.000000e+00> : vector<8xf32>
    %20 = vector.multi_reduction <add>, %19, %cst_17 [1] : vector<8x32xf32> to vector<8xf32>
    %21 = vector.shape_cast %20 : vector<8xf32> to vector<8x1xf32>
    %cst_18 = arith.constant 3.200000e+01 : f32
    %22 = vector.broadcast %cst_18 : f32 to vector<8x1xf32>
    %23 = arith.divf %21, %22 : vector<8x1xf32>
    %24 = vector.broadcast %23 : vector<8x1xf32> to vector<8x32xf32>
    %25 = arith.subf %19, %24 : vector<8x32xf32>
    %26 = arith.mulf %25, %25 : vector<8x32xf32>
    %cst_19 = arith.constant dense<0.000000e+00> : vector<8xf32>
    %27 = vector.multi_reduction <add>, %26, %cst_19 [1] : vector<8x32xf32> to vector<8xf32>
    %28 = vector.shape_cast %27 : vector<8xf32> to vector<8x1xf32>
    %cst_20 = arith.constant 3.200000e+01 : f32
    %29 = vector.broadcast %cst_20 : f32 to vector<8x1xf32>
    %30 = arith.divf %28, %29 : vector<8x1xf32>
    %cst_21 = arith.constant 9.99999974E-6 : f32
    %31 = vector.broadcast %cst_21 : f32 to vector<8x1xf32>
    %32 = arith.addf %30, %31 : vector<8x1xf32>
    %33 = math.rsqrt %32 : vector<8x1xf32>
    %34 = vector.broadcast %33 : vector<8x1xf32> to vector<8x32xf32>
    %35 = arith.mulf %25, %34 : vector<8x32xf32>
    %36 = vector.shape_cast %7 : vector<32xf32> to vector<1x32xf32>
    %37 = vector.broadcast %36 : vector<1x32xf32> to vector<8x32xf32>
    %38 = arith.mulf %35, %37 : vector<8x32xf32>
    %39 = vector.shape_cast %9 : vector<32xf32> to vector<1x32xf32>
    %40 = vector.broadcast %39 : vector<1x32xf32> to vector<8x32xf32>
    %41 = arith.addf %38, %40 : vector<8x32xf32>
    %cst_22 = arith.constant 0.000000e+00 : f32
    %42 = vector.broadcast %cst_22 : f32 to vector<8x32xf32>
    %43 = arith.maximumf %41, %42 : vector<8x32xf32>
    %c0_i32 = arith.constant 0 : i32
    %c0_23 = arith.constant 0 : index
    %44 = arith.index_cast %c0_i32 : i32 to index
    %c0_24 = arith.constant 0 : index
    %c0_25 = arith.constant 0 : index
    %45 = vector.load %arg9[%c0_23, %44, %c0_24, %c0_25] : memref<1x2x6x32xf32, #tpu.memory_space<vmem>>, vector<1x1x6x32xf32>
    %46 = vector.shape_cast %45 : vector<1x1x6x32xf32> to vector<6x32xf32>
    %47 = arith.truncf %43 : vector<8x32xf32> to vector<8x32xbf16>
    %c0_26 = arith.constant 0 : index
    %48 = arith.index_cast %c0_i32 : i32 to index
    %c0_27 = arith.constant 0 : index
    %c0_28 = arith.constant 0 : index
    %49 = vector.load %arg7[%c0_26, %48, %c0_27, %c0_28] : memref<1x2x32x32xbf16, #tpu.memory_space<vmem>>, vector<1x1x32x32xbf16>
    %50 = vector.shape_cast %49 : vector<1x1x32x32xbf16> to vector<32x32xbf16>
    %cst_29 = arith.constant dense<0.000000e+00> : vector<8x32xf32>
    %51 = tpu.matmul %47, %50, %cst_29 {dimension_numbers = #tpu.dot_dimension_numbers<[1], [0], [0], [1], [0, 0, 1, 1], [], []>} : vector<8x32xbf16>, vector<32x32xbf16>, vector<8x32xf32> -> vector<8x32xf32>
    %52 = vector.extract_strided_slice %46 {offsets = [0, 0], sizes = [1, 32], strides = [1, 1]} : vector<6x32xf32> to vector<1x32xf32>
    %53 = vector.shape_cast %52 : vector<1x32xf32> to vector<32xf32>
    %54 = vector.shape_cast %53 : vector<32xf32> to vector<1x32xf32>
    %55 = vector.broadcast %54 : vector<1x32xf32> to vector<8x32xf32>
    %56 = arith.addf %51, %55 : vector<8x32xf32>
    %57 = vector.extract_strided_slice %46 {offsets = [1, 0], sizes = [1, 32], strides = [1, 1]} : vector<6x32xf32> to vector<1x32xf32>
    %58 = vector.shape_cast %57 : vector<1x32xf32> to vector<32xf32>
    %59 = vector.extract_strided_slice %46 {offsets = [2, 0], sizes = [1, 32], strides = [1, 1]} : vector<6x32xf32> to vector<1x32xf32>
    %60 = vector.shape_cast %59 : vector<1x32xf32> to vector<32xf32>
    %cst_30 = arith.constant dense<0.000000e+00> : vector<8xf32>
    %61 = vector.multi_reduction <add>, %56, %cst_30 [1] : vector<8x32xf32> to vector<8xf32>
    %62 = vector.shape_cast %61 : vector<8xf32> to vector<8x1xf32>
    %cst_31 = arith.constant 3.200000e+01 : f32
    %63 = vector.broadcast %cst_31 : f32 to vector<8x1xf32>
    %64 = arith.divf %62, %63 : vector<8x1xf32>
    %65 = vector.broadcast %64 : vector<8x1xf32> to vector<8x32xf32>
    %66 = arith.subf %56, %65 : vector<8x32xf32>
    %67 = arith.mulf %66, %66 : vector<8x32xf32>
    %cst_32 = arith.constant dense<0.000000e+00> : vector<8xf32>
    %68 = vector.multi_reduction <add>, %67, %cst_32 [1] : vector<8x32xf32> to vector<8xf32>
    %69 = vector.shape_cast %68 : vector<8xf32> to vector<8x1xf32>
    %cst_33 = arith.constant 3.200000e+01 : f32
    %70 = vector.broadcast %cst_33 : f32 to vector<8x1xf32>
    %71 = arith.divf %69, %70 : vector<8x1xf32>
    %cst_34 = arith.constant 9.99999974E-6 : f32
    %72 = vector.broadcast %cst_34 : f32 to vector<8x1xf32>
    %73 = arith.addf %71, %72 : vector<8x1xf32>
    %74 = math.rsqrt %73 : vector<8x1xf32>
    %75 = vector.broadcast %74 : vector<8x1xf32> to vector<8x32xf32>
    %76 = arith.mulf %66, %75 : vector<8x32xf32>
    %77 = vector.shape_cast %58 : vector<32xf32> to vector<1x32xf32>
    %78 = vector.broadcast %77 : vector<1x32xf32> to vector<8x32xf32>
    %79 = arith.mulf %76, %78 : vector<8x32xf32>
    %80 = vector.shape_cast %60 : vector<32xf32> to vector<1x32xf32>
    %81 = vector.broadcast %80 : vector<1x32xf32> to vector<8x32xf32>
    %82 = arith.addf %79, %81 : vector<8x32xf32>
    %cst_35 = arith.constant 0.000000e+00 : f32
    %83 = vector.broadcast %cst_35 : f32 to vector<8x32xf32>
    %84 = arith.maximumf %82, %83 : vector<8x32xf32>
    %85 = arith.truncf %84 : vector<8x32xf32> to vector<8x32xbf16>
    %c0_36 = arith.constant 0 : index
    %86 = arith.index_cast %c0_i32 : i32 to index
    %c0_37 = arith.constant 0 : index
    %c0_38 = arith.constant 0 : index
    %87 = vector.load %arg8[%c0_36, %86, %c0_37, %c0_38] : memref<1x2x32x32xbf16, #tpu.memory_space<vmem>>, vector<1x1x32x32xbf16>
    %88 = vector.shape_cast %87 : vector<1x1x32x32xbf16> to vector<32x32xbf16>
    %cst_39 = arith.constant dense<0.000000e+00> : vector<8x32xf32>
    %89 = tpu.matmul %85, %88, %cst_39 {dimension_numbers = #tpu.dot_dimension_numbers<[1], [0], [0], [1], [0, 0, 1, 1], [], []>} : vector<8x32xbf16>, vector<32x32xbf16>, vector<8x32xf32> -> vector<8x32xf32>
    %90 = vector.extract_strided_slice %46 {offsets = [3, 0], sizes = [1, 32], strides = [1, 1]} : vector<6x32xf32> to vector<1x32xf32>
    %91 = vector.shape_cast %90 : vector<1x32xf32> to vector<32xf32>
    %92 = vector.shape_cast %91 : vector<32xf32> to vector<1x32xf32>
    %93 = vector.broadcast %92 : vector<1x32xf32> to vector<8x32xf32>
    %94 = arith.addf %89, %93 : vector<8x32xf32>
    %95 = vector.extract_strided_slice %46 {offsets = [4, 0], sizes = [1, 32], strides = [1, 1]} : vector<6x32xf32> to vector<1x32xf32>
    %96 = vector.shape_cast %95 : vector<1x32xf32> to vector<32xf32>
    %97 = vector.extract_strided_slice %46 {offsets = [5, 0], sizes = [1, 32], strides = [1, 1]} : vector<6x32xf32> to vector<1x32xf32>
    %98 = vector.shape_cast %97 : vector<1x32xf32> to vector<32xf32>
    %cst_40 = arith.constant dense<0.000000e+00> : vector<8xf32>
    %99 = vector.multi_reduction <add>, %94, %cst_40 [1] : vector<8x32xf32> to vector<8xf32>
    %100 = vector.shape_cast %99 : vector<8xf32> to vector<8x1xf32>
    %cst_41 = arith.constant 3.200000e+01 : f32
    %101 = vector.broadcast %cst_41 : f32 to vector<8x1xf32>
    %102 = arith.divf %100, %101 : vector<8x1xf32>
    %103 = vector.broadcast %102 : vector<8x1xf32> to vector<8x32xf32>
    %104 = arith.subf %94, %103 : vector<8x32xf32>
    %105 = arith.mulf %104, %104 : vector<8x32xf32>
    %cst_42 = arith.constant dense<0.000000e+00> : vector<8xf32>
    %106 = vector.multi_reduction <add>, %105, %cst_42 [1] : vector<8x32xf32> to vector<8xf32>
    %107 = vector.shape_cast %106 : vector<8xf32> to vector<8x1xf32>
    %cst_43 = arith.constant 3.200000e+01 : f32
    %108 = vector.broadcast %cst_43 : f32 to vector<8x1xf32>
    %109 = arith.divf %107, %108 : vector<8x1xf32>
    %cst_44 = arith.constant 9.99999974E-6 : f32
    %110 = vector.broadcast %cst_44 : f32 to vector<8x1xf32>
    %111 = arith.addf %109, %110 : vector<8x1xf32>
    %112 = math.rsqrt %111 : vector<8x1xf32>
    %113 = vector.broadcast %112 : vector<8x1xf32> to vector<8x32xf32>
    %114 = arith.mulf %104, %113 : vector<8x32xf32>
    %115 = vector.shape_cast %96 : vector<32xf32> to vector<1x32xf32>
    %116 = vector.broadcast %115 : vector<1x32xf32> to vector<8x32xf32>
    %117 = arith.mulf %114, %116 : vector<8x32xf32>
    %118 = vector.shape_cast %98 : vector<32xf32> to vector<1x32xf32>
    %119 = vector.broadcast %118 : vector<1x32xf32> to vector<8x32xf32>
    %120 = arith.addf %117, %119 : vector<8x32xf32>
    %121 = arith.addf %43, %120 : vector<8x32xf32>
    %c1_i32 = arith.constant 1 : i32
    %c0_45 = arith.constant 0 : index
    %122 = arith.index_cast %c1_i32 : i32 to index
    %c0_46 = arith.constant 0 : index
    %c0_47 = arith.constant 0 : index
    %123 = vector.load %arg9[%c0_45, %122, %c0_46, %c0_47] : memref<1x2x6x32xf32, #tpu.memory_space<vmem>>, vector<1x1x6x32xf32>
    %124 = vector.shape_cast %123 : vector<1x1x6x32xf32> to vector<6x32xf32>
    %125 = arith.truncf %121 : vector<8x32xf32> to vector<8x32xbf16>
    %c0_48 = arith.constant 0 : index
    %126 = arith.index_cast %c1_i32 : i32 to index
    %c0_49 = arith.constant 0 : index
    %c0_50 = arith.constant 0 : index
    %127 = vector.load %arg7[%c0_48, %126, %c0_49, %c0_50] : memref<1x2x32x32xbf16, #tpu.memory_space<vmem>>, vector<1x1x32x32xbf16>
    %128 = vector.shape_cast %127 : vector<1x1x32x32xbf16> to vector<32x32xbf16>
    %cst_51 = arith.constant dense<0.000000e+00> : vector<8x32xf32>
    %129 = tpu.matmul %125, %128, %cst_51 {dimension_numbers = #tpu.dot_dimension_numbers<[1], [0], [0], [1], [0, 0, 1, 1], [], []>} : vector<8x32xbf16>, vector<32x32xbf16>, vector<8x32xf32> -> vector<8x32xf32>
    %130 = vector.extract_strided_slice %124 {offsets = [0, 0], sizes = [1, 32], strides = [1, 1]} : vector<6x32xf32> to vector<1x32xf32>
    %131 = vector.shape_cast %130 : vector<1x32xf32> to vector<32xf32>
    %132 = vector.shape_cast %131 : vector<32xf32> to vector<1x32xf32>
    %133 = vector.broadcast %132 : vector<1x32xf32> to vector<8x32xf32>
    %134 = arith.addf %129, %133 : vector<8x32xf32>
    %135 = vector.extract_strided_slice %124 {offsets = [1, 0], sizes = [1, 32], strides = [1, 1]} : vector<6x32xf32> to vector<1x32xf32>
    %136 = vector.shape_cast %135 : vector<1x32xf32> to vector<32xf32>
    %137 = vector.extract_strided_slice %124 {offsets = [2, 0], sizes = [1, 32], strides = [1, 1]} : vector<6x32xf32> to vector<1x32xf32>
    %138 = vector.shape_cast %137 : vector<1x32xf32> to vector<32xf32>
    %cst_52 = arith.constant dense<0.000000e+00> : vector<8xf32>
    %139 = vector.multi_reduction <add>, %134, %cst_52 [1] : vector<8x32xf32> to vector<8xf32>
    %140 = vector.shape_cast %139 : vector<8xf32> to vector<8x1xf32>
    %cst_53 = arith.constant 3.200000e+01 : f32
    %141 = vector.broadcast %cst_53 : f32 to vector<8x1xf32>
    %142 = arith.divf %140, %141 : vector<8x1xf32>
    %143 = vector.broadcast %142 : vector<8x1xf32> to vector<8x32xf32>
    %144 = arith.subf %134, %143 : vector<8x32xf32>
    %145 = arith.mulf %144, %144 : vector<8x32xf32>
    %cst_54 = arith.constant dense<0.000000e+00> : vector<8xf32>
    %146 = vector.multi_reduction <add>, %145, %cst_54 [1] : vector<8x32xf32> to vector<8xf32>
    %147 = vector.shape_cast %146 : vector<8xf32> to vector<8x1xf32>
    %cst_55 = arith.constant 3.200000e+01 : f32
    %148 = vector.broadcast %cst_55 : f32 to vector<8x1xf32>
    %149 = arith.divf %147, %148 : vector<8x1xf32>
    %cst_56 = arith.constant 9.99999974E-6 : f32
    %150 = vector.broadcast %cst_56 : f32 to vector<8x1xf32>
    %151 = arith.addf %149, %150 : vector<8x1xf32>
    %152 = math.rsqrt %151 : vector<8x1xf32>
    %153 = vector.broadcast %152 : vector<8x1xf32> to vector<8x32xf32>
    %154 = arith.mulf %144, %153 : vector<8x32xf32>
    %155 = vector.shape_cast %136 : vector<32xf32> to vector<1x32xf32>
    %156 = vector.broadcast %155 : vector<1x32xf32> to vector<8x32xf32>
    %157 = arith.mulf %154, %156 : vector<8x32xf32>
    %158 = vector.shape_cast %138 : vector<32xf32> to vector<1x32xf32>
    %159 = vector.broadcast %158 : vector<1x32xf32> to vector<8x32xf32>
    %160 = arith.addf %157, %159 : vector<8x32xf32>
    %cst_57 = arith.constant 0.000000e+00 : f32
    %161 = vector.broadcast %cst_57 : f32 to vector<8x32xf32>
    %162 = arith.maximumf %160, %161 : vector<8x32xf32>
    %163 = arith.truncf %162 : vector<8x32xf32> to vector<8x32xbf16>
    %c0_58 = arith.constant 0 : index
    %164 = arith.index_cast %c1_i32 : i32 to index
    %c0_59 = arith.constant 0 : index
    %c0_60 = arith.constant 0 : index
    %165 = vector.load %arg8[%c0_58, %164, %c0_59, %c0_60] : memref<1x2x32x32xbf16, #tpu.memory_space<vmem>>, vector<1x1x32x32xbf16>
    %166 = vector.shape_cast %165 : vector<1x1x32x32xbf16> to vector<32x32xbf16>
    %cst_61 = arith.constant dense<0.000000e+00> : vector<8x32xf32>
    %167 = tpu.matmul %163, %166, %cst_61 {dimension_numbers = #tpu.dot_dimension_numbers<[1], [0], [0], [1], [0, 0, 1, 1], [], []>} : vector<8x32xbf16>, vector<32x32xbf16>, vector<8x32xf32> -> vector<8x32xf32>
    %168 = vector.extract_strided_slice %124 {offsets = [3, 0], sizes = [1, 32], strides = [1, 1]} : vector<6x32xf32> to vector<1x32xf32>
    %169 = vector.shape_cast %168 : vector<1x32xf32> to vector<32xf32>
    %170 = vector.shape_cast %169 : vector<32xf32> to vector<1x32xf32>
    %171 = vector.broadcast %170 : vector<1x32xf32> to vector<8x32xf32>
    %172 = arith.addf %167, %171 : vector<8x32xf32>
    %173 = vector.extract_strided_slice %124 {offsets = [4, 0], sizes = [1, 32], strides = [1, 1]} : vector<6x32xf32> to vector<1x32xf32>
    %174 = vector.shape_cast %173 : vector<1x32xf32> to vector<32xf32>
    %175 = vector.extract_strided_slice %124 {offsets = [5, 0], sizes = [1, 32], strides = [1, 1]} : vector<6x32xf32> to vector<1x32xf32>
    %176 = vector.shape_cast %175 : vector<1x32xf32> to vector<32xf32>
    %cst_62 = arith.constant dense<0.000000e+00> : vector<8xf32>
    %177 = vector.multi_reduction <add>, %172, %cst_62 [1] : vector<8x32xf32> to vector<8xf32>
    %178 = vector.shape_cast %177 : vector<8xf32> to vector<8x1xf32>
    %cst_63 = arith.constant 3.200000e+01 : f32
    %179 = vector.broadcast %cst_63 : f32 to vector<8x1xf32>
    %180 = arith.divf %178, %179 : vector<8x1xf32>
    %181 = vector.broadcast %180 : vector<8x1xf32> to vector<8x32xf32>
    %182 = arith.subf %172, %181 : vector<8x32xf32>
    %183 = arith.mulf %182, %182 : vector<8x32xf32>
    %cst_64 = arith.constant dense<0.000000e+00> : vector<8xf32>
    %184 = vector.multi_reduction <add>, %183, %cst_64 [1] : vector<8x32xf32> to vector<8xf32>
    %185 = vector.shape_cast %184 : vector<8xf32> to vector<8x1xf32>
    %cst_65 = arith.constant 3.200000e+01 : f32
    %186 = vector.broadcast %cst_65 : f32 to vector<8x1xf32>
    %187 = arith.divf %185, %186 : vector<8x1xf32>
    %cst_66 = arith.constant 9.99999974E-6 : f32
    %188 = vector.broadcast %cst_66 : f32 to vector<8x1xf32>
    %189 = arith.addf %187, %188 : vector<8x1xf32>
    %190 = math.rsqrt %189 : vector<8x1xf32>
    %191 = vector.broadcast %190 : vector<8x1xf32> to vector<8x32xf32>
    %192 = arith.mulf %182, %191 : vector<8x32xf32>
    %193 = vector.shape_cast %174 : vector<32xf32> to vector<1x32xf32>
    %194 = vector.broadcast %193 : vector<1x32xf32> to vector<8x32xf32>
    %195 = arith.mulf %192, %194 : vector<8x32xf32>
    %196 = vector.shape_cast %176 : vector<32xf32> to vector<1x32xf32>
    %197 = vector.broadcast %196 : vector<1x32xf32> to vector<8x32xf32>
    %198 = arith.addf %195, %197 : vector<8x32xf32>
    %199 = arith.addf %121, %198 : vector<8x32xf32>
    %c2_i32 = arith.constant 2 : i32
    %200 = arith.truncf %199 : vector<8x32xf32> to vector<8x32xbf16>
    %c0_67 = arith.constant 0 : index
    %c0_68 = arith.constant 0 : index
    %c0_69 = arith.constant 0 : index
    %201 = vector.load %arg10[%c0_67, %c0_68, %c0_69] : memref<1x32x1xbf16, #tpu.memory_space<vmem>>, vector<1x32x1xbf16>
    %202 = vector.shape_cast %201 : vector<1x32x1xbf16> to vector<32x1xbf16>
    %cst_70 = arith.constant dense<0.000000e+00> : vector<8x1xf32>
    %203 = tpu.matmul %200, %202, %cst_70 {dimension_numbers = #tpu.dot_dimension_numbers<[1], [0], [0], [1], [0, 0, 1, 1], [], []>} : vector<8x32xbf16>, vector<32x1xbf16>, vector<8x1xf32> -> vector<8x1xf32>
    %c0_71 = arith.constant 0 : index
    %c0_72 = arith.constant 0 : index
    %c0_73 = arith.constant 0 : index
    %204 = vector.load %arg11[%c0_71, %c0_72, %c0_73] : memref<1x1x1xf32, #tpu.memory_space<vmem>>, vector<1x1x1xf32>
    %205 = vector.shape_cast %204 : vector<1x1x1xf32> to vector<1x1xf32>
    %206 = vector.broadcast %205 : vector<1x1xf32> to vector<8x1xf32>
    %207 = arith.addf %203, %206 : vector<8x1xf32>
    %c0_74 = arith.constant 0 : index
    %c0_75 = arith.constant 0 : index
    %c0_76 = arith.constant 0 : index
    %208 = vector.load %arg12[%c0_74, %c0_75, %c0_76] : memref<1x8x1xf32, #tpu.memory_space<vmem>>, vector<1x8x1xf32>
    %209 = vector.shape_cast %208 : vector<1x8x1xf32> to vector<8x1xf32>
    %210 = vector.shape_cast %207 : vector<8x1xf32> to vector<1x8x1xf32>
    tpu.vector_store %arg12[%c0_74, %c0_75, %c0_76], %210 {strides = array<i32>} : memref<1x8x1xf32, #tpu.memory_space<vmem>>, vector<1x8x1xf32>,
    return
  }
  func.func @transform_0(%arg0: i32, %arg1: i32) -> (i32, i32) {
    %c0_i32 = arith.constant 0 : i32
    %c0_i32_0 = arith.constant 0 : i32
    return %arg1, %c0_i32 : i32, i32
  }
  func.func @transform_1(%arg0: i32, %arg1: i32) -> (i32, i32) {
    %c0_i32 = arith.constant 0 : i32
    %c0_i32_0 = arith.constant 0 : i32
    return %arg1, %c0_i32 : i32, i32
  }
  func.func @transform_2(%arg0: i32, %arg1: i32) -> (i32, i32, i32) {
    %c0_i32 = arith.constant 0 : i32
    %c0_i32_0 = arith.constant 0 : i32
    %c0_i32_1 = arith.constant 0 : i32
    return %arg0, %c0_i32, %c0_i32_0 : i32, i32, i32
  }
  func.func @transform_3(%arg0: i32, %arg1: i32) -> (i32, i32, i32) {
    %c0_i32 = arith.constant 0 : i32
    %c0_i32_0 = arith.constant 0 : i32
    %c0_i32_1 = arith.constant 0 : i32
    return %arg0, %c0_i32, %c0_i32_0 : i32, i32, i32
  }
  func.func @transform_4(%arg0: i32, %arg1: i32) -> (i32, i32, i32) {
    %c0_i32 = arith.constant 0 : i32
    %c0_i32_0 = arith.constant 0 : i32
    %c0_i32_1 = arith.constant 0 : i32
    return %arg0, %c0_i32, %c0_i32_0 : i32, i32, i32
  }
  func.func @transform_5(%arg0: i32, %arg1: i32) -> (i32, i32, i32, i32) {
    %c0_i32 = arith.constant 0 : i32
    %c0_i32_0 = arith.constant 0 : i32
    %c0_i32_1 = arith.constant 0 : i32
    %c0_i32_2 = arith.constant 0 : i32
    return %arg0, %c0_i32, %c0_i32_0, %c0_i32_1 : i32, i32, i32, i32
  }
  func.func @transform_6(%arg0: i32, %arg1: i32) -> (i32, i32, i32, i32) {
    %c0_i32 = arith.constant 0 : i32
    %c0_i32_0 = arith.constant 0 : i32
    %c0_i32_1 = arith.constant 0 : i32
    %c0_i32_2 = arith.constant 0 : i32
    return %arg0, %c0_i32, %c0_i32_0, %c0_i32_1 : i32, i32, i32, i32
  }
  func.func @transform_7(%arg0: i32, %arg1: i32) -> (i32, i32, i32, i32) {
    %c0_i32 = arith.constant 0 : i32
    %c0_i32_0 = arith.constant 0 : i32
    %c0_i32_1 = arith.constant 0 : i32
    %c0_i32_2 = arith.constant 0 : i32
    return %arg0, %c0_i32, %c0_i32_0, %c0_i32_1 : i32, i32, i32, i32
  }
  func.func @transform_8(%arg0: i32, %arg1: i32) -> (i32, i32, i32) {
    %c0_i32 = arith.constant 0 : i32
    %c0_i32_0 = arith.constant 0 : i32
    %c0_i32_1 = arith.constant 0 : i32
    return %arg0, %c0_i32, %c0_i32_0 : i32, i32, i32
  }
  func.func @transform_9(%arg0: i32, %arg1: i32) -> (i32, i32, i32) {
    %c0_i32 = arith.constant 0 : i32
    %c0_i32_0 = arith.constant 0 : i32
    %c0_i32_1 = arith.constant 0 : i32
    return %arg0, %c0_i32, %c0_i32_0 : i32, i32, i32
  }
  func.func @transform_10(%arg0: i32, %arg1: i32) -> (i32, i32, i32) {
    %c0_i32 = arith.constant 0 : i32
    %c0_i32_0 = arith.constant 0 : i32
    return %arg0, %arg1, %c0_i32 : i32, i32, i32
  }
}

</mosaic_0001>

<bundles_post_ra>
// kernel: tpu_custom_call.1
= control target key start
LH: loop header
LB: loop body
LE: loop exit
PB: predicated region body
PF: predicated region fallthrough
CT: control target
= control target key end

     0   :  { %15 = vsyncpa [#allocation3], 0  ;;  %s1928_s0 = inlined_call_operand.hbm [shape: f32[8,12], index: 0, kind: input, shape index: {}]   ;;  %s1929_s1 = inlined_call_operand.hbm [shape: f32[8,6], index: 1, kind: input, shape index: {}]   ;;  %s1930_s2 = inlined_call_operand.vmem [shape: bf16[2,12,32], index: 2, kind: input, shape index: {}]   ;;  %s1931_s3 = inlined_call_operand.vmem [shape: bf16[2,6,32], index: 3, kind: input, shape index: {}]   ;;  %s1932_s4 = inlined_call_operand.vmem [shape: f32[2,3,32], index: 4, kind: input, shape index: {}]   ;;  %s1933_s5 = inlined_call_operand.vmem [shape: bf16[2,2,32,32], index: 5, kind: input, shape index: {}]   ;;  %s1934_s6 = inlined_call_operand.vmem [shape: bf16[2,2,32,32], index: 6, kind: input, shape index: {}]   ;;  %s1935_s7 = inlined_call_operand.vmem [shape: f32[2,2,6,32], index: 7, kind: input, shape index: {}]   ;;  %s1936_s8 = inlined_call_operand.vmem [shape: bf16[2,32,1], index: 8, kind: input, shape index: {}]   ;;  %s1937_s9 = inlined_call_operand.vmem [shape: f32[2,1,1], index: 9, kind: input, shape index: {}]   ;;  %s1938_s10 = inlined_call_operand.vmem [shape: f32[2,8,1], index: 10, kind: output, shape index: {}]  }
   0x1   :  { %16 = vsyncpa [#allocation5], 0  ;;  %s1663_s13 = smov 0   ;;  %s1665_s14 = smov 0  }
   0x2   :  { %s1667_s15 = smov 0  }
   0x3 LB: > { %s1318_s16 = sadd.s32 4294967295, %s1602_s15   ;;  %s34_s17 = sadd.s32 1, %s1598_s14  ;;  %s1602_s15 = sphi %s1667_s15, %s22_s15   ;;  %s1598_s14 = sphi %s1665_s14, %s1948_s14   ;;  %s1594_s13 = sphi %s1663_s13, %s1947_s13  }
   0x4   : > { %p36_p0 = scmp.ge.s32.totalorder %s34_s17, 2  ;;  %p1320_p1 = scmp.ge.s32.totalorder %s1602_s15, 1 }
   0x5   : > { %p327_p2 = scmp.lt.s32.totalorder %s1602_s15, 3  ;;  %p1688_p4 = scmp.eq.s32.totalorder %s1318_s16, 0 }
   0x6   : > { %s1950_s17 = smov (%p36_p0, %s34_s17), 0  ;;  %s1604_s20 = smov [#allocation2]  }
   0x7   : > { %p1684_p3 = pnand %p1320_p1, %p327_p2  ;;  %s342_s21 = sshll.u32 %s1604_s20, 4  ;;  %s343_s21 = int_to_ptr.vmem [resolvable:$true] %s342_s21 }
   0x8   : > { %s1943_s19 = scalar_select %p1688_p4, 1, 0 }
   0x9   : > { %s1942_s18 = scalar_select %p1684_p3, 1, 0 }
   0xa   : > { %p1456_p5 = pneg %p1684_p3  ;;  %s1605_s22 = smov [#allocation4]  }
   0xb   : > { %s355_s23 = sshll.u32 %s1605_s22, 4  ;;  %s1516_s27 = scalar_lea.hbm %s1928_s0, 128  ;;  %s1700_s23 = int_to_ptr.vmem [resolvable:$true] %s355_s23 }
   0xc   : > { %p1696_p6 = pnand %p1688_p4, %p1456_p5  ;;  %p1517_p7 = scmp.ne.s32.totalorder %s1928_s0, %s1516_s27 }
   0xd   : > { %p1523_p11 = scmp.lt.u32.totalorder %s1516_s27, %s1928_s0 }
   0xe   : > { %p1518_p8 = pneg %p1696_p6 }
  0x10   : > { %p1519_p9 = pnand %p1518_p8, %p1517_p7 }
  0x12   : > { %p1520_p10 = pneg %p1519_p9 }
  0x14   : > { %p1525_p12 = pnand %p1523_p11, %p1520_p10 }
  0x16   : > { %1528 = shalt.err (!%p1525_p12)
}
  0x17   : > { %s1529_s12 = scalar_lea.vmem %s343_s21, 128  ;;  %p1537_p2 = scmp.lt.s32.totalorder %s343_s21, %s343_s21 }
  0x18   : > { %p1530_p13 = scmp.ne.s32.totalorder %s343_s21, %s1529_s12  ;;  %p1538_p5 = scmp.lt.s32.totalorder %s1529_s12, %s1529_s12 }
  0x1a   : > { %p1532_p0 = pnand %p1530_p13, %p1518_p8  ;;  %p1539_p4 = por %p1538_p5, %p1537_p2 }
  0x1c   : > { %p1533_p1 = pneg %p1532_p0 }
  0x1e   : > { %p1540_p3 = pnand %p1539_p4, %p1533_p1 }
  0x20   : > { %1543 = shalt.err (!%p1540_p3)
}
  0x21   : > { %1459 = dma.hbm_to_vmem [thread:$0]  (!%p1696_p6), %s1928_s0, 128, %s343_s21, [#allocation3]  }
  0x22   : > { %s1544_s26 = scalar_lea.hbm %s1929_s1, 128 }
  0x23   : > { %p1545_p7 = scmp.ne.s32.totalorder %s1929_s1, %s1544_s26  ;;  %p1551_p3 = scmp.lt.u32.totalorder %s1544_s26, %s1929_s1 }
  0x25   : > { %p1547_p9 = pnand %p1545_p7, %p1518_p8 }
  0x27   : > { %p1548_p4 = pneg %p1547_p9 }
  0x29   : > { %p1553_p10 = pnand %p1551_p3, %p1548_p4 }
  0x2b   : > { %1556 = shalt.err (!%p1553_p10)
}
  0x2c   : > { %s1557_s21 = scalar_lea.vmem %s1700_s23, 128  ;;  %p1565_p0 = scmp.lt.s32.totalorder %s1700_s23, %s1700_s23 }
  0x2d   : > { %p1558_p11 = scmp.ne.s32.totalorder %s1700_s23, %s1557_s21  ;;  %p1566_p1 = scmp.lt.s32.totalorder %s1557_s21, %s1557_s21 }
  0x2f   : > { %p1560_p12 = pnand %p1558_p11, %p1518_p8  ;;  %p1567_p2 = por %p1566_p1, %p1565_p0 }
  0x31   : > { %p1561_p13 = pneg %p1560_p12 }
  0x33   : > { %p1568_p5 = pnand %p1567_p2, %p1561_p13 }
  0x35   : > { %1571 = shalt.err (!%p1568_p5)
}
  0x36   : > { %1462 = dma.hbm_to_vmem [thread:$0]  (!%p1696_p6), %s1929_s1, 128, %s1700_s23, [#allocation5]  }
  0x37   : > { %p1945_p7 = scmp.ne.s32.totalorder %s1942_s18, 0 }
  0x38   : > { %p1946_p9 = scmp.ne.s32.totalorder (!%p1945_p7), %s1943_s19, 0 }
  0x39   : > { %428 = sbr.rel (%p1945_p7) target bundleno = 2950 (0xb86), region = 60 }
  0x40   : > { %1585 = dma.done.wait (%p1946_p9), [#allocation3], 128  }
  0x41   : > { %1587 = vsyncadd (%p1946_p9), [#allocation3], 4294967168 }
  0x42   : > { %1589 = dma.done.wait (%p1946_p9), [#allocation5], 128  }
  0x43   : > { %1591 = vsyncadd (%p1946_p9), [#allocation5], 4294967168  ;;  %p503_p8 = scmp.lt.s32.totalorder %s1594_s13, 1  ;;  %v1606_v0 = vmov 0.0   ;;  %vm1607_vm0 = vmmov 0   ;;  %vm561_vm1 = vcmask 1042432   ;;  %v695_v39 = vlaneseq }
  0x44   : > { %1396 = vmatprep.subr.bf16.mxu0 %v1606_v0  ;;  %1402 = vmatprep.subr.bf16.mxu1 %v1606_v0  ;;  %vm614_vm2 = vcmask 1045504   ;;  %v549_v3 = vld [vmem:[#allocation4] sm:$0xff]  ;;  %vm557_vm3 = vcmask 48128   ;;  %v547_v6 = vld [vmem:[#allocation2] sm:$0xff]  ;;  %vm610_vm4 = vcmask 97280   ;;  %vm663_vm5 = vcmask 261120  }
  0x45   : > { %s1952_s13 = smov (!%p503_p8, %s1594_s13), 1  ;;  %1398 = vmatprep.mubr.msk.bf16.mxu0 %vm1607_vm0, %v1606_v0  ;;  %1404 = vmatprep.mubr.msk.bf16.mxu1 %vm1607_vm0, %v1606_v0  ;;  %v550_v5 = vpack.c.bf16 %v549_v3, %v549_v3  ;;  %v548_v8 = vpack.c.bf16 %v547_v6, %v547_v6  ;;  %v1815_v40 = vshrl.u32 %v695_v39, 7  ;;  %vm1113_vm6 = vcmask 7168  }
  0x46   : > { %s1328_s18 = sshll.u32 %s1952_s13, 2  ;;  %s1372_s19 = sshll.u32 %s1952_s13, 3 }
  0x47   : > { %s511_s16 = scalar_lea.vmem %s1931_s3, %s1328_s18  ;;  %s507_s25 = scalar_lea.vmem %s1930_s2, %s1372_s19  ;;  %v697_v41 = vsub.s32 0, %v1815_v40  ;;  %v769_v60 = vsub.s32 1, %v1815_v40  ;;  %v774_v61 = vsub.s32 2, %v1815_v40 }
  0x48   : > { %v556_v1 = vld [vmem:[%s511_s16] sm:$0x7]  ;;  %s1788_s28 = scalar_lea.vmem %s1932_s4, %s1328_s18  ;;  %s1373_s29 = sshll.u32 %s1952_s13, 5 }
  0x49   : > { %v563_v2 = vsel %vm561_vm1, %v556_v1, 0  ;;  %v1495_v4 = vld [vmem:[%s507_s25] sm:$0x3f]   ;;  %s1799_s11 = scalar_lea.vmem %s1933_s5, %s1373_s29  ;;  %s1375_s12 = sshll.u32 %s1952_s13, 4 }
  0x4a   : > { %1397 = vmatpush3.bf16.msra.mxu0 %v563_v2  ;;  %v616_v7 = vsel %vm614_vm2, %v1495_v4, 0  ;;  %v1342_v14 = vld [vmem:[%s1788_s28] ss:$0 sm:$0xff]  ;;  %v1497_v27 = vld [vmem:[%s1799_s11 + $0x8] sm:$0xff]   ;;  %v1343_v32 = vld [vmem:[%s1788_s28 + $0x1] ss:$0 sm:$0xff]  ;;  %s1822_s24 = scalar_lea.vmem %s1935_s7, %s1375_s12  ;;  %s1838_s22 = scalar_lea.vmem %s1934_s6, %s1373_s29 }
  0x4b   : > { %1408 = vmatprep.subr.bf16.mxu0 %v1606_v0  ;;  %1403 = vmatpush3.bf16.msra.mxu1 %v616_v7  ;;  %v1496_v26 = vld [vmem:[%s1799_s11] sm:$0xff]   ;;  %v1499_v56 = vld [vmem:[%s1838_s22 + $0x8] sm:$0xff]   ;;  %v785_v7 = vsub.s32 3, %v1815_v40  ;;  %s535_s27 = scalar_lea.vmem %s1936_s8, %s1375_s12  ;;  %s538_s30 = scalar_lea.vmem %s1937_s9, %s1952_s13 }
  0x4c   : > { %1416 = vmatprep.subr.bf16.mxu1 %v1606_v0  ;;  %v1344_v34 = vld [vmem:[%s1788_s28 + $0x2] ss:$0 sm:$0xff]  ;;  %s545_s12 = scalar_lea.vmem %s1938_s10, %s1372_s19 }
  0x4d   : > { %1399 = vmatmul.mubr.msk.bf16.vlgmr.msra.gmra.mrb[0].mxu0 %vm557_vm3, %v550_v5  ;;  %v1826_v42 = vld [vmem:[%s1822_s24] sm:$0x3f] }
  0x4e   : > { %1412 = vmatprep.mubr.msk.bf16.mxu0 %vm1607_vm0, %v1606_v0  ;;  %1405 = vmatmul.mubr.msk.bf16.vlgmr.msra.gmra.mrb[0].mxu1 %vm610_vm4, %v548_v8  ;;  %v698_v43 = vrot.slane %v1826_v42, %v697_v41  ;;  %v1498_v55 = vld [vmem:[%s1838_s22] sm:$0xff]   ;;  %v770_v62 = vrot.slane %v1826_v42, %v769_v60  ;;  %v775_v2 = vrot.slane %v1826_v42, %v774_v61 }
  0x4f   : > { %1420 = vmatprep.mubr.msk.bf16.mxu1 %vm1607_vm0, %v1606_v0  ;;  %1409 = vmatpush3.bf16.msra.mxu0 %v1496_v26  ;;  %v786_v8 = vrot.slane %v1826_v42, %v785_v7  ;;  %v862_v26 = vsub.s32 5, %v1815_v40 }
  0x50   : > { %1410 = vmatprep.subr.bf16.mxu0 %v1606_v0  ;;  %1417 = vmatpush3.bf16.msra.mxu1 %v1498_v55 }
  0x51   : > { %1418 = vmatprep.subr.bf16.mxu1 %v1606_v0 }
  0x53   : > { %1411 = vmatpush3.bf16.msra.mxu0 %v1497_v27 }
  0x54   : > { %1424 = vmatprep.subr.bf16.mxu0 %v1606_v0  ;;  %1419 = vmatpush3.bf16.msra.mxu1 %v1499_v56 }
  0x55   : > { %1432 = vmatprep.subr.bf16.mxu1 %v1606_v0 }
 0x120   : > { %v599_v9 = vpop.f32.mrb[0].mxu0 }
 0x121   : > { %v1400_v10 = vpop.f32.mrb[1].mxu0  ;;  %v652_v12 = vpop.f32.mrb[0].mxu1 }
 0x122   : > { %v602_v11 = vpop.f32.mrb[2].mxu0  ;;  %v653_v15 = vadd.f32 %v652_v12, %v599_v9  ;;  %v1406_v16 = vpop.f32.mrb[1].mxu1 }
 0x123   : > { %v1401_v13 = vpop.f32.mrb[3].mxu0  ;;  %v655_v17 = vpop.f32.mrb[2].mxu1 }
 0x124   : > { %v1407_v18 = vpop.f32.mrb[3].mxu1  ;;  %v662_v19 = vadd.f32 %v1342_v14, %v653_v15 }
 0x126   : > { %v664_v20 = vsel %vm663_vm5, %v662_v19, 0.0 }
 0x127   : > { %665 = vadd.xlane.f32.xlu0 %v664_v20  ;;  %v1500_v20 = vld [vmem:[%s1799_s11 + $0x10] sm:$0xff]  }
 0x1b4   : > { %v666_v21 = vpop.xlane.xlu0 %665 }
 0x1b5   : > { %v668_v22 = vmul.f32 0.03125, %v666_v21  ;;  %v1501_v21 = vld [vmem:[%s1799_s11 + $0x18] sm:$0xff]  }
 0x1b7   : > { %v669_v23 = vsub.f32 %v662_v19, %v668_v22 }
 0x1b9   : > { %v670_v24 = vmul.f32 %v669_v23, %v669_v23 }
 0x1bb   : > { %v671_v25 = vsel %vm663_vm5, %v670_v24, 0.0 }
 0x1bc   : > { %672 = vadd.xlane.f32.xlu0 %v671_v25  ;;  %v857_v25 = vsub.s32 4, %v1815_v40 }
 0x1be   : > { %v858_v27 = vrot.slane %v1826_v42, %v857_v25 }
 0x249   : > { %v673_v28 = vpop.xlane.xlu0 %672 }
 0x24a   : > { %v674_v29 = vmul.f32 0.03125, %v673_v28 }
 0x24c   : > { %v675_v30 = vadd.f32 1e-05, %v674_v29 }
 0x24e   : > { %1506 = vrsqrt.f32 %v675_v30  ;;  %v863_v30 = vrot.slane %v1826_v42, %v862_v26 }
 0x258   : > { %v1507_v31 = vpop.eup %1506 }
 0x259   : > { %v677_v33 = vmul.f32 %v1507_v31, %v669_v23 }
 0x25b   : > { %v682_v35 = vmul.f32 %v1343_v32, %v677_v33 }
 0x25d   : > { %v687_v36 = vadd.f32 %v1344_v34, %v682_v35  ;;  %v1351_v35 = vld [vmem:[%s1822_s24 + $0x8] sm:$0x3f] }
 0x25f   : > { %v1807_v37 = vmax.f32 %v687_v36, 0.0  ;;  %v877_v36 = vrot.slane %v1351_v35, %v697_v41 }
 0x261   : > { %v690_v38 = vpack.c.bf16 %v1807_v37, %v1807_v37 }
 0x263   : > { %1413 = vmatmul.mubr.msk.bf16.vlgmr.msra.gmra.mrb[4].mxu0 %vm663_vm5, %v690_v38 }
 0x264   : > { %1428 = vmatprep.mubr.msk.bf16.mxu0 %vm1607_vm0, %v1606_v0  ;;  %1425 = vmatpush3.bf16.msra.mxu0 %v1500_v20 }
 0x265   : > { %1426 = vmatprep.subr.bf16.mxu0 %v1606_v0 }
 0x268   : > { %1427 = vmatpush3.bf16.msra.mxu0 %v1501_v21 }
 0x269   : > { %1440 = vmatprep.subr.bf16.mxu0 %v1606_v0 }
 0x336   : > { %v748_v44 = vpop.f32.mrb[4].mxu0 }
 0x337   : > { %v749_v45 = vadd.f32 %v748_v44, %v698_v43  ;;  %v1414_v46 = vpop.f32.mrb[5].mxu0 }
 0x338   : > { %v751_v47 = vpop.f32.mrb[6].mxu0 }
 0x339   : > { %v1415_v48 = vpop.f32.mrb[7].mxu0  ;;  %v754_v49 = vsel %vm663_vm5, %v749_v45, 0.0 }
 0x33a   : > { %755 = vadd.xlane.f32.xlu1 %v754_v49 }
 0x3c7   : > { %v756_v50 = vpop.xlane.xlu1 %755 }
 0x3c8   : > { %v757_v51 = vmul.f32 0.03125, %v756_v50  ;;  %v1502_v50 = vld [vmem:[%s1838_s22 + $0x10] sm:$0xff]  }
 0x3ca   : > { %v758_v52 = vsub.f32 %v749_v45, %v757_v51  ;;  %v1503_v51 = vld [vmem:[%s1838_s22 + $0x18] sm:$0xff]  }
 0x3cc   : > { %v759_v53 = vmul.f32 %v758_v52, %v758_v52 }
 0x3ce   : > { %v760_v54 = vsel %vm663_vm5, %v759_v53, 0.0 }
 0x3cf   : > { %761 = vadd.xlane.f32.xlu1 %v760_v54  ;;  %v949_v54 = vrot.slane %v1351_v35, %v769_v60 }
 0x45c   : > { %v762_v57 = vpop.xlane.xlu1 %761 }
 0x45d   : > { %v763_v58 = vmul.f32 0.03125, %v762_v57  ;;  %v954_v57 = vrot.slane %v1351_v35, %v774_v61 }
 0x45f   : > { %v764_v59 = vadd.f32 1e-05, %v763_v58 }
 0x461   : > { %1508 = vrsqrt.f32 %v764_v59 }
 0x46b   : > { %v1509_v63 = vpop.eup %1508 }
 0x46c   : > { %v766_v1 = vmul.f32 %v1509_v63, %v758_v52 }
 0x46e   : > { %v771_v3 = vmul.f32 %v770_v62, %v766_v1  ;;  %v966_v1 = vrot.slane %v1351_v35, %v785_v7  ;;  %v1504_v7 = vld [vmem:[%s535_s27] sm:$0xff]  }
 0x470   : > { %v776_v4 = vadd.f32 %v775_v2, %v771_v3 }
 0x472   : > { %v777_v5 = vmax.f32 %v776_v4, 0.0 }
 0x474   : > { %v778_v6 = vpack.c.bf16 %v777_v5, %v777_v5 }
 0x476   : > { %1421 = vmatmul.mubr.msk.bf16.vlgmr.msra.gmra.mrb[4].mxu1 %vm663_vm5, %v778_v6 }
 0x477   : > { %1436 = vmatprep.mubr.msk.bf16.mxu1 %vm1607_vm0, %v1606_v0  ;;  %1433 = vmatpush3.bf16.msra.mxu1 %v1502_v50 }
 0x478   : > { %1434 = vmatprep.subr.bf16.mxu1 %v1606_v0 }
 0x47b   : > { %1435 = vmatpush3.bf16.msra.mxu1 %v1503_v51 }
 0x549   : > { %v836_v9 = vpop.f32.mrb[4].mxu1 }
 0x54a   : > { %v837_v10 = vadd.f32 %v836_v9, %v786_v8  ;;  %v1422_v11 = vpop.f32.mrb[5].mxu1 }
 0x54b   : > { %v839_v12 = vpop.f32.mrb[6].mxu1 }
 0x54c   : > { %v1423_v13 = vpop.f32.mrb[7].mxu1  ;;  %v842_v14 = vsel %vm663_vm5, %v837_v10, 0.0  ;;  %v1505_v12 = vld [vmem:[%s535_s27 + $0x8] sm:$0xff]  }
 0x54d   : > { %843 = vadd.xlane.f32.xlu0 %v842_v14 }
 0x5da   : > { %v844_v15 = vpop.xlane.xlu0 %843 }
 0x5db   : > { %v845_v16 = vmul.f32 0.03125, %v844_v15 }
 0x5dd   : > { %v846_v17 = vsub.f32 %v837_v10, %v845_v16  ;;  %v1038_v16 = vrot.slane %v1351_v35, %v857_v25 }
 0x5df   : > { %v847_v18 = vmul.f32 %v846_v17, %v846_v17 }
 0x5e1   : > { %v848_v19 = vsel %vm663_vm5, %v847_v18, 0.0 }
 0x5e2   : > { %849 = vadd.xlane.f32.xlu1 %v848_v19  ;;  %v1043_v19 = vrot.slane %v1351_v35, %v862_v26 }
 0x66f   : > { %v850_v22 = vpop.xlane.xlu1 %849 }
 0x670   : > { %v851_v23 = vmul.f32 0.03125, %v850_v22 }
 0x672   : > { %v852_v24 = vadd.f32 1e-05, %v851_v23 }
 0x674   : > { %1510 = vrsqrt.f32 %v852_v24 }
 0x67e   : > { %v1511_v28 = vpop.eup %1510 }
 0x67f   : > { %v854_v29 = vmul.f32 %v1511_v28, %v846_v17 }
 0x681   : > { %v859_v31 = vmul.f32 %v858_v27, %v854_v29 }
 0x683   : > { %v864_v32 = vadd.f32 %v863_v30, %v859_v31 }
 0x685   : > { %v1874_v33 = vadd.f32 %v864_v32, %v1807_v37 }
 0x687   : > { %v868_v34 = vpack.c.bf16 %v1874_v33, %v1874_v33 }
 0x689   : > { %1429 = vmatmul.mubr.msk.bf16.vlgmr.msra.gmra.mrb[8].mxu0 %vm663_vm5, %v868_v34 }
 0x68a   : > { %1444 = vmatprep.mubr.msk.bf16.mxu0 %vm1607_vm0, %v1606_v0  ;;  %1441 = vmatpush3.bf16.msra.mxu0 %v1504_v7 }
 0x68b   : > { %1442 = vmatprep.subr.bf16.mxu0 %v1606_v0  ;;  %v1366_v0 = vld [vmem:[%s538_s30] ss:$0 sm:$0xff] }
 0x68e   : > { %1443 = vmatpush3.bf16.msra.mxu0 %v1505_v12 }
 0x75c   : > { %v927_v38 = vpop.f32.mrb[8].mxu0 }
 0x75d   : > { %v928_v39 = vadd.f32 %v927_v38, %v877_v36  ;;  %v1430_v42 = vpop.f32.mrb[9].mxu0 }
 0x75e   : > { %v930_v43 = vpop.f32.mrb[10].mxu0 }
 0x75f   : > { %v1431_v37 = vpop.f32.mrb[11].mxu0  ;;  %v933_v44 = vsel %vm663_vm5, %v928_v39, 0.0 }
 0x760   : > { %934 = vadd.xlane.f32.xlu0 %v933_v44 }
 0x7ed   : > { %v935_v45 = vpop.xlane.xlu0 %934 }
 0x7ee   : > { %v936_v46 = vmul.f32 0.03125, %v935_v45 }
 0x7f0   : > { %v937_v47 = vsub.f32 %v928_v39, %v936_v46 }
 0x7f2   : > { %v938_v48 = vmul.f32 %v937_v47, %v937_v47 }
 0x7f4   : > { %v939_v49 = vsel %vm663_vm5, %v938_v48, 0.0 }
 0x7f5   : > { %940 = vadd.xlane.f32.xlu1 %v939_v49 }
 0x882   : > { %v941_v41 = vpop.xlane.xlu1 %940 }
 0x883   : > { %v942_v52 = vmul.f32 0.03125, %v941_v41 }
 0x885   : > { %v943_v53 = vadd.f32 1e-05, %v942_v52 }
 0x887   : > { %1512 = vrsqrt.f32 %v943_v53 }
 0x891   : > { %v1513_v55 = vpop.eup %1512 }
 0x892   : > { %v945_v56 = vmul.f32 %v1513_v55, %v937_v47 }
 0x894   : > { %v950_v58 = vmul.f32 %v949_v54, %v945_v56 }
 0x896   : > { %v955_v59 = vadd.f32 %v954_v57, %v950_v58 }
 0x898   : > { %v956_v62 = vmax.f32 %v955_v59, 0.0 }
 0x89a   : > { %v957_v63 = vpack.c.bf16 %v956_v62, %v956_v62 }
 0x89c   : > { %1437 = vmatmul.mubr.msk.bf16.vlgmr.msra.gmra.mrb[8].mxu1 %vm663_vm5, %v957_v63 }
 0x96f   : > { %v1016_v2 = vpop.f32.mrb[8].mxu1 }
 0x970   : > { %v1017_v3 = vadd.f32 %v1016_v2, %v966_v1  ;;  %v1438_v4 = vpop.f32.mrb[9].mxu1 }
 0x971   : > { %v1019_v5 = vpop.f32.mrb[10].mxu1 }
 0x972   : > { %v1439_v60 = vpop.f32.mrb[11].mxu1  ;;  %v1022_v6 = vsel %vm663_vm5, %v1017_v3, 0.0 }
 0x973   : > { %1023 = vadd.xlane.f32.xlu0 %v1022_v6 }
 0xa00   : > { %v1024_v8 = vpop.xlane.xlu0 %1023 }
 0xa01   : > { %v1025_v61 = vmul.f32 0.03125, %v1024_v8 }
 0xa03   : > { %v1026_v9 = vsub.f32 %v1017_v3, %v1025_v61 }
 0xa05   : > { %v1027_v10 = vmul.f32 %v1026_v9, %v1026_v9 }
 0xa07   : > { %v1028_v11 = vsel %vm663_vm5, %v1027_v10, 0.0 }
 0xa08   : > { %1029 = vadd.xlane.f32.xlu1 %v1028_v11 }
 0xa95   : > { %v1030_v13 = vpop.xlane.xlu1 %1029 }
 0xa96   : > { %v1031_v14 = vmul.f32 0.03125, %v1030_v13 }
 0xa98   : > { %v1032_v15 = vadd.f32 1e-05, %v1031_v14 }
 0xa9a   : > { %1514 = vrsqrt.f32 %v1032_v15 }
 0xaa4   : > { %v1515_v17 = vpop.eup %1514 }
 0xaa5   : > { %v1034_v18 = vmul.f32 %v1515_v17, %v1026_v9 }
 0xaa7   : > { %v1039_v20 = vmul.f32 %v1038_v16, %v1034_v18 }
 0xaa9   : > { %v1044_v21 = vadd.f32 %v1043_v19, %v1039_v20 }
 0xaab   : > { %v1045_v22 = vadd.f32 %v1044_v21, %v1874_v33 }
 0xaad   : > { %v1046_v23 = vpack.c.bf16 %v1045_v22, %v1045_v22 }
 0xaaf   : > { %1445 = vmatmul.mubr.msk.bf16.vlgmr.msra.gmra.mrb[12].mxu0 %vm663_vm5, %v1046_v23 }
 0xb82   : > { %v1107_v24 = vpop.f32.mrb[12].mxu0 }
 0xb83   : > { %v1108_v40 = vadd.f32 %v1366_v0, %v1107_v24  ;;  %v1446_v25 = vpop.f32.mrb[13].mxu0 }
 0xb84   : > { %v1110_v26 = vpop.f32.mrb[14].mxu0 }
 0xb85   : > { %1114 = vst.msk [vmem:[%s545_s12] sm:$0xff] %vm1113_vm6, %v1108_v40  ;;  %v1447_v27 = vpop.f32.mrb[15].mxu0 }
 0xb86 PF: > { %s22_s15 = sadd.s32 1, %s1602_s15   ;;  %s1947_s13 = smov %s1598_s14 }
 0xb87   : > { %p19_p6 = scmp.ge.s32.totalorder %s22_s15, 4   ;;  %s1948_s14 = smov %s1950_s17 }
 0xb89   :  { %21 = sbr.rel (!%p19_p6) target bundleno = 3 (0x3), region = 125 }
 0xb90   :  { %1140 = vsyncpa [#allocation3], 1 }
 0xb91   :  { %1142 = vsyncpa [#allocation3 + $0x1], 1 }
 0xb92   :  { %1143 = vsyncpa [#allocation5], 1 }

// kernel: tpu_custom_call.1
= control target key start
LH: loop header
LB: loop body
LE: loop exit
PB: predicated region body
PF: predicated region fallthrough
CT: control target
= control target key end

     0   :  { %15 = vsyncpa [#allocation3], 0  ;;  %s1905_s0 = inlined_call_operand.hbm [shape: f32[8,12], index: 0, kind: input, shape index: {}]   ;;  %s1906_s1 = inlined_call_operand.hbm [shape: f32[8,6], index: 1, kind: input, shape index: {}]   ;;  %s1907_s2 = inlined_call_operand.vmem [shape: bf16[2,12,32], index: 2, kind: input, shape index: {}]   ;;  %s1908_s3 = inlined_call_operand.vmem [shape: bf16[2,6,32], index: 3, kind: input, shape index: {}]   ;;  %s1909_s4 = inlined_call_operand.vmem [shape: f32[2,3,32], index: 4, kind: input, shape index: {}]   ;;  %s1910_s5 = inlined_call_operand.vmem [shape: bf16[2,2,32,32], index: 5, kind: input, shape index: {}]   ;;  %s1911_s6 = inlined_call_operand.vmem [shape: bf16[2,2,32,32], index: 6, kind: input, shape index: {}]   ;;  %s1912_s7 = inlined_call_operand.vmem [shape: f32[2,2,6,32], index: 7, kind: input, shape index: {}]   ;;  %s1913_s8 = inlined_call_operand.vmem [shape: bf16[2,32,1], index: 8, kind: input, shape index: {}]   ;;  %s1914_s9 = inlined_call_operand.vmem [shape: f32[2,1,1], index: 9, kind: input, shape index: {}]   ;;  %s1915_s10 = inlined_call_operand.vmem [shape: f32[2,8,1], index: 10, kind: output, shape index: {}]  }
   0x1   :  { %16 = vsyncpa [#allocation5], 0  ;;  %s1640_s13 = smov 0   ;;  %s1642_s14 = smov 0  }
   0x2   :  { %s1644_s15 = smov 0  }
   0x3 LB: > { %s1294_s16 = sadd.s32 4294967295, %s1579_s15   ;;  %s34_s17 = sadd.s32 1, %s1575_s14  ;;  %s1579_s15 = sphi %s1644_s15, %s22_s15   ;;  %s1575_s14 = sphi %s1642_s14, %s1925_s14   ;;  %s1571_s13 = sphi %s1640_s13, %s1924_s13  }
   0x4   : > { %p36_p0 = scmp.ge.s32.totalorder %s34_s17, 2  ;;  %p1296_p1 = scmp.ge.s32.totalorder %s1579_s15, 1 }
   0x5   : > { %p327_p2 = scmp.lt.s32.totalorder %s1579_s15, 3  ;;  %p1665_p4 = scmp.eq.s32.totalorder %s1294_s16, 0 }
   0x6   : > { %s1927_s17 = smov (%p36_p0, %s34_s17), 0  ;;  %s1581_s20 = smov [#allocation2]  }
   0x7   : > { %p1661_p3 = pnand %p1296_p1, %p327_p2  ;;  %s342_s21 = sshll.u32 %s1581_s20, 4  ;;  %s343_s21 = int_to_ptr.vmem [resolvable:$true] %s342_s21 }
   0x8   : > { %s1920_s19 = scalar_select %p1665_p4, 1, 0 }
   0x9   : > { %s1919_s18 = scalar_select %p1661_p3, 1, 0 }
   0xa   : > { %p1433_p5 = pneg %p1661_p3  ;;  %s1582_s22 = smov [#allocation4]  }
   0xb   : > { %s355_s23 = sshll.u32 %s1582_s22, 4  ;;  %s1493_s27 = scalar_lea.hbm %s1905_s0, 128  ;;  %s1677_s23 = int_to_ptr.vmem [resolvable:$true] %s355_s23 }
   0xc   : > { %p1673_p6 = pnand %p1665_p4, %p1433_p5  ;;  %p1494_p7 = scmp.ne.s32.totalorder %s1905_s0, %s1493_s27 }
   0xd   : > { %p1500_p11 = scmp.lt.u32.totalorder %s1493_s27, %s1905_s0 }
   0xe   : > { %p1495_p8 = pneg %p1673_p6 }
  0x10   : > { %p1496_p9 = pnand %p1495_p8, %p1494_p7 }
  0x12   : > { %p1497_p10 = pneg %p1496_p9 }
  0x14   : > { %p1502_p12 = pnand %p1500_p11, %p1497_p10 }
  0x16   : > { %1505 = shalt.err (!%p1502_p12)
}
  0x17   : > { %s1506_s12 = scalar_lea.vmem %s343_s21, 128  ;;  %p1514_p2 = scmp.lt.s32.totalorder %s343_s21, %s343_s21 }
  0x18   : > { %p1507_p13 = scmp.ne.s32.totalorder %s343_s21, %s1506_s12  ;;  %p1515_p5 = scmp.lt.s32.totalorder %s1506_s12, %s1506_s12 }
  0x1a   : > { %p1509_p0 = pnand %p1507_p13, %p1495_p8  ;;  %p1516_p4 = por %p1515_p5, %p1514_p2 }
  0x1c   : > { %p1510_p1 = pneg %p1509_p0 }
  0x1e   : > { %p1517_p3 = pnand %p1516_p4, %p1510_p1 }
  0x20   : > { %1520 = shalt.err (!%p1517_p3)
}
  0x21   : > { %1436 = dma.hbm_to_vmem [thread:$0]  (!%p1673_p6), %s1905_s0, 128, %s343_s21, [#allocation3]  }
  0x22   : > { %s1521_s26 = scalar_lea.hbm %s1906_s1, 128 }
  0x23   : > { %p1522_p7 = scmp.ne.s32.totalorder %s1906_s1, %s1521_s26  ;;  %p1528_p3 = scmp.lt.u32.totalorder %s1521_s26, %s1906_s1 }
  0x25   : > { %p1524_p9 = pnand %p1522_p7, %p1495_p8 }
  0x27   : > { %p1525_p4 = pneg %p1524_p9 }
  0x29   : > { %p1530_p10 = pnand %p1528_p3, %p1525_p4 }
  0x2b   : > { %1533 = shalt.err (!%p1530_p10)
}
  0x2c   : > { %s1534_s21 = scalar_lea.vmem %s1677_s23, 128  ;;  %p1542_p0 = scmp.lt.s32.totalorder %s1677_s23, %s1677_s23 }
  0x2d   : > { %p1535_p11 = scmp.ne.s32.totalorder %s1677_s23, %s1534_s21  ;;  %p1543_p1 = scmp.lt.s32.totalorder %s1534_s21, %s1534_s21 }
  0x2f   : > { %p1537_p12 = pnand %p1535_p11, %p1495_p8  ;;  %p1544_p2 = por %p1543_p1, %p1542_p0 }
  0x31   : > { %p1538_p13 = pneg %p1537_p12 }
  0x33   : > { %p1545_p5 = pnand %p1544_p2, %p1538_p13 }
  0x35   : > { %1548 = shalt.err (!%p1545_p5)
}
  0x36   : > { %1439 = dma.hbm_to_vmem [thread:$0]  (!%p1673_p6), %s1906_s1, 128, %s1677_s23, [#allocation5]  }
  0x37   : > { %p1922_p7 = scmp.ne.s32.totalorder %s1919_s18, 0 }
  0x38   : > { %p1923_p9 = scmp.ne.s32.totalorder (!%p1922_p7), %s1920_s19, 0 }
  0x39   : > { %428 = sbr.rel (%p1922_p7) target bundleno = 2950 (0xb86), region = 60 }
  0x40   : > { %1562 = dma.done.wait (%p1923_p9), [#allocation3], 128  }
  0x41   : > { %1564 = vsyncadd (%p1923_p9), [#allocation3], 4294967168 }
  0x42   : > { %1566 = dma.done.wait (%p1923_p9), [#allocation5], 128  }
  0x43   : > { %1568 = vsyncadd (%p1923_p9), [#allocation5], 4294967168  ;;  %p503_p8 = scmp.lt.s32.totalorder %s1571_s13, 1  ;;  %v1583_v0 = vmov 0.0   ;;  %vm1584_vm0 = vmmov 0   ;;  %vm561_vm1 = vcmask 1042432   ;;  %v695_v39 = vlaneseq }
  0x44   : > { %1373 = vmatprep.subr.bf16.mxu0 %v1583_v0  ;;  %1379 = vmatprep.subr.bf16.mxu1 %v1583_v0  ;;  %vm614_vm2 = vcmask 1045504   ;;  %v549_v3 = vld [vmem:[#allocation4] sm:$0xff]  ;;  %vm557_vm3 = vcmask 48128   ;;  %v547_v6 = vld [vmem:[#allocation2] sm:$0xff]  ;;  %vm610_vm4 = vcmask 97280   ;;  %vm663_vm5 = vcmask 261120  }
  0x45   : > { %s1929_s13 = smov (!%p503_p8, %s1571_s13), 1  ;;  %1375 = vmatprep.mubr.msk.bf16.mxu0 %vm1584_vm0, %v1583_v0  ;;  %1381 = vmatprep.mubr.msk.bf16.mxu1 %vm1584_vm0, %v1583_v0  ;;  %v550_v5 = vpack.c.bf16 %v549_v3, %v549_v3  ;;  %v548_v8 = vpack.c.bf16 %v547_v6, %v547_v6  ;;  %v1792_v40 = vshrl.u32 %v695_v39, 7  ;;  %vm1113_vm6 = vcmask 7168  }
  0x46   : > { %s1305_s18 = sshll.u32 %s1929_s13, 2  ;;  %s1349_s19 = sshll.u32 %s1929_s13, 3 }
  0x47   : > { %s511_s16 = scalar_lea.vmem %s1908_s3, %s1305_s18  ;;  %s507_s25 = scalar_lea.vmem %s1907_s2, %s1349_s19  ;;  %v697_v41 = vsub.s32 0, %v1792_v40  ;;  %v769_v60 = vsub.s32 1, %v1792_v40  ;;  %v774_v61 = vsub.s32 2, %v1792_v40 }
  0x48   : > { %v556_v1 = vld [vmem:[%s511_s16] sm:$0x7]  ;;  %s1765_s28 = scalar_lea.vmem %s1909_s4, %s1305_s18  ;;  %s1350_s29 = sshll.u32 %s1929_s13, 5 }
  0x49   : > { %v563_v2 = vsel %vm561_vm1, %v556_v1, 0  ;;  %v1472_v4 = vld [vmem:[%s507_s25] sm:$0x3f]   ;;  %s1776_s11 = scalar_lea.vmem %s1910_s5, %s1350_s29  ;;  %s1352_s12 = sshll.u32 %s1929_s13, 4 }
  0x4a   : > { %1374 = vmatpush3.bf16.msra.mxu0 %v563_v2  ;;  %v616_v7 = vsel %vm614_vm2, %v1472_v4, 0  ;;  %v1319_v14 = vld [vmem:[%s1765_s28] ss:$0 sm:$0xff]  ;;  %v1474_v27 = vld [vmem:[%s1776_s11 + $0x8] sm:$0xff]   ;;  %v1320_v32 = vld [vmem:[%s1765_s28 + $0x1] ss:$0 sm:$0xff]  ;;  %s1799_s24 = scalar_lea.vmem %s1912_s7, %s1352_s12  ;;  %s1815_s22 = scalar_lea.vmem %s1911_s6, %s1350_s29 }
  0x4b   : > { %1385 = vmatprep.subr.bf16.mxu0 %v1583_v0  ;;  %1380 = vmatpush3.bf16.msra.mxu1 %v616_v7  ;;  %v1473_v26 = vld [vmem:[%s1776_s11] sm:$0xff]   ;;  %v1476_v56 = vld [vmem:[%s1815_s22 + $0x8] sm:$0xff]   ;;  %v785_v7 = vsub.s32 3, %v1792_v40  ;;  %s535_s27 = scalar_lea.vmem %s1913_s8, %s1352_s12  ;;  %s538_s30 = scalar_lea.vmem %s1914_s9, %s1929_s13 }
  0x4c   : > { %1393 = vmatprep.subr.bf16.mxu1 %v1583_v0  ;;  %v1321_v34 = vld [vmem:[%s1765_s28 + $0x2] ss:$0 sm:$0xff]  ;;  %s545_s12 = scalar_lea.vmem %s1915_s10, %s1349_s19 }
  0x4d   : > { %1376 = vmatmul.mubr.msk.bf16.vlgmr.msra.gmra.mrb[0].mxu0 %vm557_vm3, %v550_v5  ;;  %v1803_v42 = vld [vmem:[%s1799_s24] sm:$0x3f] }
  0x4e   : > { %1389 = vmatprep.mubr.msk.bf16.mxu0 %vm1584_vm0, %v1583_v0  ;;  %1382 = vmatmul.mubr.msk.bf16.vlgmr.msra.gmra.mrb[0].mxu1 %vm610_vm4, %v548_v8  ;;  %v698_v43 = vrot.slane %v1803_v42, %v697_v41  ;;  %v1475_v55 = vld [vmem:[%s1815_s22] sm:$0xff]   ;;  %v770_v62 = vrot.slane %v1803_v42, %v769_v60  ;;  %v775_v2 = vrot.slane %v1803_v42, %v774_v61 }
  0x4f   : > { %1397 = vmatprep.mubr.msk.bf16.mxu1 %vm1584_vm0, %v1583_v0  ;;  %1386 = vmatpush3.bf16.msra.mxu0 %v1473_v26  ;;  %v786_v8 = vrot.slane %v1803_v42, %v785_v7  ;;  %v862_v26 = vsub.s32 5, %v1792_v40 }
  0x50   : > { %1387 = vmatprep.subr.bf16.mxu0 %v1583_v0  ;;  %1394 = vmatpush3.bf16.msra.mxu1 %v1475_v55 }
  0x51   : > { %1395 = vmatprep.subr.bf16.mxu1 %v1583_v0 }
  0x53   : > { %1388 = vmatpush3.bf16.msra.mxu0 %v1474_v27 }
  0x54   : > { %1401 = vmatprep.subr.bf16.mxu0 %v1583_v0  ;;  %1396 = vmatpush3.bf16.msra.mxu1 %v1476_v56 }
  0x55   : > { %1409 = vmatprep.subr.bf16.mxu1 %v1583_v0 }
 0x120   : > { %v599_v9 = vpop.f32.mrb[0].mxu0 }
 0x121   : > { %v1377_v10 = vpop.f32.mrb[1].mxu0  ;;  %v652_v12 = vpop.f32.mrb[0].mxu1 }
 0x122   : > { %v602_v11 = vpop.f32.mrb[2].mxu0  ;;  %v653_v15 = vadd.f32 %v652_v12, %v599_v9  ;;  %v1383_v16 = vpop.f32.mrb[1].mxu1 }
 0x123   : > { %v1378_v13 = vpop.f32.mrb[3].mxu0  ;;  %v655_v17 = vpop.f32.mrb[2].mxu1 }
 0x124   : > { %v1384_v18 = vpop.f32.mrb[3].mxu1  ;;  %v662_v19 = vadd.f32 %v1319_v14, %v653_v15 }
 0x126   : > { %v664_v20 = vsel %vm663_vm5, %v662_v19, 0.0 }
 0x127   : > { %665 = vadd.xlane.f32.xlu0 %v664_v20  ;;  %v1477_v20 = vld [vmem:[%s1776_s11 + $0x10] sm:$0xff]  }
 0x1b4   : > { %v666_v21 = vpop.xlane.xlu0 %665 }
 0x1b5   : > { %v668_v22 = vmul.f32 0.03125, %v666_v21  ;;  %v1478_v21 = vld [vmem:[%s1776_s11 + $0x18] sm:$0xff]  }
 0x1b7   : > { %v669_v23 = vsub.f32 %v662_v19, %v668_v22 }
 0x1b9   : > { %v670_v24 = vmul.f32 %v669_v23, %v669_v23 }
 0x1bb   : > { %v671_v25 = vsel %vm663_vm5, %v670_v24, 0.0 }
 0x1bc   : > { %672 = vadd.xlane.f32.xlu0 %v671_v25  ;;  %v857_v25 = vsub.s32 4, %v1792_v40 }
 0x1be   : > { %v858_v27 = vrot.slane %v1803_v42, %v857_v25 }
 0x249   : > { %v673_v28 = vpop.xlane.xlu0 %672 }
 0x24a   : > { %v674_v29 = vmul.f32 0.03125, %v673_v28 }
 0x24c   : > { %v675_v30 = vadd.f32 1e-05, %v674_v29 }
 0x24e   : > { %1483 = vrsqrt.f32 %v675_v30  ;;  %v863_v30 = vrot.slane %v1803_v42, %v862_v26 }
 0x258   : > { %v1484_v31 = vpop.eup %1483 }
 0x259   : > { %v677_v33 = vmul.f32 %v1484_v31, %v669_v23 }
 0x25b   : > { %v682_v35 = vmul.f32 %v1320_v32, %v677_v33 }
 0x25d   : > { %v687_v36 = vadd.f32 %v1321_v34, %v682_v35  ;;  %v1328_v35 = vld [vmem:[%s1799_s24 + $0x8] sm:$0x3f] }
 0x25f   : > { %v1784_v37 = vmax.f32 %v687_v36, 0.0  ;;  %v877_v36 = vrot.slane %v1328_v35, %v697_v41 }
 0x261   : > { %v690_v38 = vpack.c.bf16 %v1784_v37, %v1784_v37 }
 0x263   : > { %1390 = vmatmul.mubr.msk.bf16.vlgmr.msra.gmra.mrb[4].mxu0 %vm663_vm5, %v690_v38 }
 0x264   : > { %1405 = vmatprep.mubr.msk.bf16.mxu0 %vm1584_vm0, %v1583_v0  ;;  %1402 = vmatpush3.bf16.msra.mxu0 %v1477_v20 }
 0x265   : > { %1403 = vmatprep.subr.bf16.mxu0 %v1583_v0 }
 0x268   : > { %1404 = vmatpush3.bf16.msra.mxu0 %v1478_v21 }
 0x269   : > { %1417 = vmatprep.subr.bf16.mxu0 %v1583_v0 }
 0x336   : > { %v748_v44 = vpop.f32.mrb[4].mxu0 }
 0x337   : > { %v749_v45 = vadd.f32 %v748_v44, %v698_v43  ;;  %v1391_v46 = vpop.f32.mrb[5].mxu0 }
 0x338   : > { %v751_v47 = vpop.f32.mrb[6].mxu0 }
 0x339   : > { %v1392_v48 = vpop.f32.mrb[7].mxu0  ;;  %v754_v49 = vsel %vm663_vm5, %v749_v45, 0.0 }
 0x33a   : > { %755 = vadd.xlane.f32.xlu1 %v754_v49 }
 0x3c7   : > { %v756_v50 = vpop.xlane.xlu1 %755 }
 0x3c8   : > { %v757_v51 = vmul.f32 0.03125, %v756_v50  ;;  %v1479_v50 = vld [vmem:[%s1815_s22 + $0x10] sm:$0xff]  }
 0x3ca   : > { %v758_v52 = vsub.f32 %v749_v45, %v757_v51  ;;  %v1480_v51 = vld [vmem:[%s1815_s22 + $0x18] sm:$0xff]  }
 0x3cc   : > { %v759_v53 = vmul.f32 %v758_v52, %v758_v52 }
 0x3ce   : > { %v760_v54 = vsel %vm663_vm5, %v759_v53, 0.0 }
 0x3cf   : > { %761 = vadd.xlane.f32.xlu1 %v760_v54  ;;  %v949_v54 = vrot.slane %v1328_v35, %v769_v60 }
 0x45c   : > { %v762_v57 = vpop.xlane.xlu1 %761 }
 0x45d   : > { %v763_v58 = vmul.f32 0.03125, %v762_v57  ;;  %v954_v57 = vrot.slane %v1328_v35, %v774_v61 }
 0x45f   : > { %v764_v59 = vadd.f32 1e-05, %v763_v58 }
 0x461   : > { %1485 = vrsqrt.f32 %v764_v59 }
 0x46b   : > { %v1486_v63 = vpop.eup %1485 }
 0x46c   : > { %v766_v1 = vmul.f32 %v1486_v63, %v758_v52 }
 0x46e   : > { %v771_v3 = vmul.f32 %v770_v62, %v766_v1  ;;  %v966_v1 = vrot.slane %v1328_v35, %v785_v7  ;;  %v1481_v7 = vld [vmem:[%s535_s27] sm:$0xff]  }
 0x470   : > { %v776_v4 = vadd.f32 %v775_v2, %v771_v3 }
 0x472   : > { %v777_v5 = vmax.f32 %v776_v4, 0.0 }
 0x474   : > { %v778_v6 = vpack.c.bf16 %v777_v5, %v777_v5 }
 0x476   : > { %1398 = vmatmul.mubr.msk.bf16.vlgmr.msra.gmra.mrb[4].mxu1 %vm663_vm5, %v778_v6 }
 0x477   : > { %1413 = vmatprep.mubr.msk.bf16.mxu1 %vm1584_vm0, %v1583_v0  ;;  %1410 = vmatpush3.bf16.msra.mxu1 %v1479_v50 }
 0x478   : > { %1411 = vmatprep.subr.bf16.mxu1 %v1583_v0 }
 0x47b   : > { %1412 = vmatpush3.bf16.msra.mxu1 %v1480_v51 }
 0x549   : > { %v836_v9 = vpop.f32.mrb[4].mxu1 }
 0x54a   : > { %v837_v10 = vadd.f32 %v836_v9, %v786_v8  ;;  %v1399_v11 = vpop.f32.mrb[5].mxu1 }
 0x54b   : > { %v839_v12 = vpop.f32.mrb[6].mxu1 }
 0x54c   : > { %v1400_v13 = vpop.f32.mrb[7].mxu1  ;;  %v842_v14 = vsel %vm663_vm5, %v837_v10, 0.0  ;;  %v1482_v12 = vld [vmem:[%s535_s27 + $0x8] sm:$0xff]  }
 0x54d   : > { %843 = vadd.xlane.f32.xlu0 %v842_v14 }
 0x5da   : > { %v844_v15 = vpop.xlane.xlu0 %843 }
 0x5db   : > { %v845_v16 = vmul.f32 0.03125, %v844_v15 }
 0x5dd   : > { %v846_v17 = vsub.f32 %v837_v10, %v845_v16  ;;  %v1038_v16 = vrot.slane %v1328_v35, %v857_v25 }
 0x5df   : > { %v847_v18 = vmul.f32 %v846_v17, %v846_v17 }
 0x5e1   : > { %v848_v19 = vsel %vm663_vm5, %v847_v18, 0.0 }
 0x5e2   : > { %849 = vadd.xlane.f32.xlu1 %v848_v19  ;;  %v1043_v19 = vrot.slane %v1328_v35, %v862_v26 }
 0x66f   : > { %v850_v22 = vpop.xlane.xlu1 %849 }
 0x670   : > { %v851_v23 = vmul.f32 0.03125, %v850_v22 }
 0x672   : > { %v852_v24 = vadd.f32 1e-05, %v851_v23 }
 0x674   : > { %1487 = vrsqrt.f32 %v852_v24 }
 0x67e   : > { %v1488_v28 = vpop.eup %1487 }
 0x67f   : > { %v854_v29 = vmul.f32 %v1488_v28, %v846_v17 }
 0x681   : > { %v859_v31 = vmul.f32 %v858_v27, %v854_v29 }
 0x683   : > { %v864_v32 = vadd.f32 %v863_v30, %v859_v31 }
 0x685   : > { %v1851_v33 = vadd.f32 %v864_v32, %v1784_v37 }
 0x687   : > { %v868_v34 = vpack.c.bf16 %v1851_v33, %v1851_v33 }
 0x689   : > { %1406 = vmatmul.mubr.msk.bf16.vlgmr.msra.gmra.mrb[8].mxu0 %vm663_vm5, %v868_v34 }
 0x68a   : > { %1421 = vmatprep.mubr.msk.bf16.mxu0 %vm1584_vm0, %v1583_v0  ;;  %1418 = vmatpush3.bf16.msra.mxu0 %v1481_v7 }
 0x68b   : > { %1419 = vmatprep.subr.bf16.mxu0 %v1583_v0  ;;  %v1343_v0 = vld [vmem:[%s538_s30] ss:$0 sm:$0xff] }
 0x68e   : > { %1420 = vmatpush3.bf16.msra.mxu0 %v1482_v12 }
 0x75c   : > { %v927_v38 = vpop.f32.mrb[8].mxu0 }
 0x75d   : > { %v928_v39 = vadd.f32 %v927_v38, %v877_v36  ;;  %v1407_v42 = vpop.f32.mrb[9].mxu0 }
 0x75e   : > { %v930_v43 = vpop.f32.mrb[10].mxu0 }
 0x75f   : > { %v1408_v37 = vpop.f32.mrb[11].mxu0  ;;  %v933_v44 = vsel %vm663_vm5, %v928_v39, 0.0 }
 0x760   : > { %934 = vadd.xlane.f32.xlu0 %v933_v44 }
 0x7ed   : > { %v935_v45 = vpop.xlane.xlu0 %934 }
 0x7ee   : > { %v936_v46 = vmul.f32 0.03125, %v935_v45 }
 0x7f0   : > { %v937_v47 = vsub.f32 %v928_v39, %v936_v46 }
 0x7f2   : > { %v938_v48 = vmul.f32 %v937_v47, %v937_v47 }
 0x7f4   : > { %v939_v49 = vsel %vm663_vm5, %v938_v48, 0.0 }
 0x7f5   : > { %940 = vadd.xlane.f32.xlu1 %v939_v49 }
 0x882   : > { %v941_v41 = vpop.xlane.xlu1 %940 }
 0x883   : > { %v942_v52 = vmul.f32 0.03125, %v941_v41 }
 0x885   : > { %v943_v53 = vadd.f32 1e-05, %v942_v52 }
 0x887   : > { %1489 = vrsqrt.f32 %v943_v53 }
 0x891   : > { %v1490_v55 = vpop.eup %1489 }
 0x892   : > { %v945_v56 = vmul.f32 %v1490_v55, %v937_v47 }
 0x894   : > { %v950_v58 = vmul.f32 %v949_v54, %v945_v56 }
 0x896   : > { %v955_v59 = vadd.f32 %v954_v57, %v950_v58 }
 0x898   : > { %v956_v62 = vmax.f32 %v955_v59, 0.0 }
 0x89a   : > { %v957_v63 = vpack.c.bf16 %v956_v62, %v956_v62 }
 0x89c   : > { %1414 = vmatmul.mubr.msk.bf16.vlgmr.msra.gmra.mrb[8].mxu1 %vm663_vm5, %v957_v63 }
 0x96f   : > { %v1016_v2 = vpop.f32.mrb[8].mxu1 }
 0x970   : > { %v1017_v3 = vadd.f32 %v1016_v2, %v966_v1  ;;  %v1415_v4 = vpop.f32.mrb[9].mxu1 }
 0x971   : > { %v1019_v5 = vpop.f32.mrb[10].mxu1 }
 0x972   : > { %v1416_v60 = vpop.f32.mrb[11].mxu1  ;;  %v1022_v6 = vsel %vm663_vm5, %v1017_v3, 0.0 }
 0x973   : > { %1023 = vadd.xlane.f32.xlu0 %v1022_v6 }
 0xa00   : > { %v1024_v8 = vpop.xlane.xlu0 %1023 }
 0xa01   : > { %v1025_v61 = vmul.f32 0.03125, %v1024_v8 }
 0xa03   : > { %v1026_v9 = vsub.f32 %v1017_v3, %v1025_v61 }
 0xa05   : > { %v1027_v10 = vmul.f32 %v1026_v9, %v1026_v9 }
 0xa07   : > { %v1028_v11 = vsel %vm663_vm5, %v1027_v10, 0.0 }
 0xa08   : > { %1029 = vadd.xlane.f32.xlu1 %v1028_v11 }
 0xa95   : > { %v1030_v13 = vpop.xlane.xlu1 %1029 }
 0xa96   : > { %v1031_v14 = vmul.f32 0.03125, %v1030_v13 }
 0xa98   : > { %v1032_v15 = vadd.f32 1e-05, %v1031_v14 }
 0xa9a   : > { %1491 = vrsqrt.f32 %v1032_v15 }
 0xaa4   : > { %v1492_v17 = vpop.eup %1491 }
 0xaa5   : > { %v1034_v18 = vmul.f32 %v1492_v17, %v1026_v9 }
 0xaa7   : > { %v1039_v20 = vmul.f32 %v1038_v16, %v1034_v18 }
 0xaa9   : > { %v1044_v21 = vadd.f32 %v1043_v19, %v1039_v20 }
 0xaab   : > { %v1045_v22 = vadd.f32 %v1044_v21, %v1851_v33 }
 0xaad   : > { %v1046_v23 = vpack.c.bf16 %v1045_v22, %v1045_v22 }
 0xaaf   : > { %1422 = vmatmul.mubr.msk.bf16.vlgmr.msra.gmra.mrb[12].mxu0 %vm663_vm5, %v1046_v23 }
 0xb82   : > { %v1107_v24 = vpop.f32.mrb[12].mxu0 }
 0xb83   : > { %v1108_v40 = vadd.f32 %v1343_v0, %v1107_v24  ;;  %v1423_v25 = vpop.f32.mrb[13].mxu0 }
 0xb84   : > { %v1110_v26 = vpop.f32.mrb[14].mxu0 }
 0xb85   : > { %1114 = vst.msk [vmem:[%s545_s12] sm:$0xff] %vm1113_vm6, %v1108_v40  ;;  %v1424_v27 = vpop.f32.mrb[15].mxu0 }
 0xb86 PF: > { %s22_s15 = sadd.s32 1, %s1579_s15   ;;  %s1924_s13 = smov %s1575_s14 }
 0xb87   : > { %p19_p6 = scmp.ge.s32.totalorder %s22_s15, 4   ;;  %s1925_s14 = smov %s1927_s17 }
 0xb89   :  { %21 = sbr.rel (!%p19_p6) target bundleno = 3 (0x3), region = 125 }
 0xb90   :  { %1140 = vsyncpa [#allocation3], 1 }
 0xb91   :  { %1142 = vsyncpa [#allocation3 + $0x1], 1 }
 0xb92   :  { %1143 = vsyncpa [#allocation5], 1 }

</bundles_post_ra>
